<compile_context>
chip_gen: v7x
topology: tpu7x:2x2x1
jax: 0.10.0
libtpu: 0.0.40
codegen_flags: <defaults>
</compile_context>

<pallas_src>
import functools

import jax
import jax.numpy as jnp
from jax.experimental import pallas as pl
from jax.experimental.pallas import tpu as pltpu


def _conv_kernel(x_ref, w_ref, o_ref, *, TH, W, KH, KW, dilation):
    """One (batch, H-tile) grid step.

    x_ref: (1, TH + 2*pad, Wp, Cin)  halo'd rows of the spatially padded input
    w_ref: (KH, KW, Cin, Cout)       full weights (resident across the grid)
    o_ref: (1, TH, W, Cout)          output tile
    """
    x = x_ref[0]                                      # (THp, Wp, Cin)
    Cout = w_ref.shape[-1]

    # Build the KW width-shifted views once (instead of KH*KW patch copies).
    # The remaining per-tap shift is a slice along H, which only selects whole
    # (sublane, lane) tiles and is effectively free.
    shifted = [x[:, kw * dilation:kw * dilation + W, :] for kw in range(KW)]

    # f32 accumulator kept in vregs; repeated MXU dots accumulate into it.
    # TODO(synk): for very large (TH, W, Cout) tiles move the accumulator into
    # a pltpu.VMEM scratch to avoid vreg spills under the unrolled tap loop.
    acc = jnp.zeros((TH, W, Cout), jnp.float32)
    for kh in range(KH):
        h0 = kh * dilation
        for kw in range(KW):
            acc = acc + jax.lax.dot_general(
                shifted[kw][h0:h0 + TH],              # (TH, W, Cin)
                w_ref[kh, kw],                        # (Cin, Cout)
                dimension_numbers=(((2,), (0,)), ((), ())),
                preferred_element_type=jnp.float32)

    # TODO(synk): for tiny Cout (<128) this store is lane-masked; a lane-dense
    # (W*Cout)-folded store would need an in-kernel lane-crossing relayout.
    # With production channel counts (>=128) the store is already lane-dense.
    o_ref[0] = acc.astype(o_ref.dtype)


def _pick_block_h(H, pad, Wp, Cin, W, Cout, itemsize):
    """Largest H-tile that divides H and keeps per-step buffers small.

    Budget: ~4 MiB per pipelined (double-buffered) input/output tile and
    ~512 KiB for the f32 register accumulator -- comfortably inside v7x's
    64 MiB physical VMEM and the default scoped limits on v5e/v6e.
    """
    tile_budget = 4 * 1024 * 1024
    acc_budget = 512 * 1024
    cap = min(
        max(tile_budget // max(Wp * Cin * itemsize, 1) - 2 * pad, 1),
        max(tile_budget // max(W * Cout * itemsize, 1), 1),
        max(acc_budget // max(W * Cout * 4, 1), 1),
        H)
    return max(d for d in range(1, H + 1) if H % d == 0 and d <= cap)


def conv_norelu_forward(x_nchw, w_oihw, *, stride=1, dilation=1,
                        block_h=None, compute_dtype=None):
    """Forward pass of conv_norelu (PyTorch NCHW / OIHW interface).

    compute_dtype=jnp.bfloat16 feeds the MXU with bf16 activations/weights
    (f32 accumulation is kept) -- the memory-bound fast path on v6e/v7x.
    """
    # TODO(synk): stride != 1 not implemented (module default stride=1).
    assert stride == 1, "only stride=1 (module default) is implemented"
    N, Cin, H, W = x_nchw.shape
    Cout, Cin_w, KH, KW = w_oihw.shape
    assert Cin_w == Cin
    assert KH == KW, "padding formula assumes a square kernel"
    pad = (KH - 1) // 2 * dilation

    if compute_dtype is not None:
        x_nchw = x_nchw.astype(compute_dtype)
        w_oihw = w_oihw.astype(compute_dtype)
    out_dtype = x_nchw.dtype
    itemsize = jnp.dtype(out_dtype).itemsize

    # Glue: NCHW->NHWC + spatial zero-pad (fused by XLA into one HBM copy).
    # TODO(synk): keep the surrounding network in NHWC and fuse the zero-pad
    # into the kernel to remove these wrapper-side HBM round trips.
    x_nhwc = jnp.transpose(x_nchw, (0, 2, 3, 1))
    x_pad = jnp.pad(x_nhwc, ((0, 0), (pad, pad), (pad, pad), (0, 0)))
    w_hwio = jnp.transpose(w_oihw, (2, 3, 1, 0))

    Hp, Wp = H + 2 * pad, W + 2 * pad

    if block_h is None:
        block_h = _pick_block_h(H, pad, Wp, Cin, W, Cout, itemsize)
    assert H % block_h == 0, "block_h must divide H"

    # TODO(synk): for large channel counts also tile Cout (lane dim) and make
    # Cin a trailing "arbitrary" reduction grid axis with a pl.when-initialized
    # accumulator; channels here are tiny so only batch/H are tiled.
    def build(th):
        nh = H // th
        thp = th + 2 * pad
        kern = functools.partial(_conv_kernel, TH=th, W=W, KH=KH, KW=KW,
                                 dilation=dilation)
        if nh == 1:
            x_spec = pl.BlockSpec((1, Hp, Wp, Cin), lambda n, i: (n, 0, 0, 0))
        else:
            # Element indexing on H: output tile i of TH rows reads the
            # overlapping halo window of TH + 2*pad padded input rows.
            x_spec = pl.BlockSpec((1, pl.Element(thp), Wp, Cin),
                                  lambda n, i: (n, i * th, 0, 0))
        return pl.pallas_call(
            kern,
            out_shape=jax.ShapeDtypeStruct((N, H, W, Cout), out_dtype),
            grid_spec=pltpu.PrefetchScalarGridSpec(
                num_scalar_prefetch=0,
                grid=(N, nh),
                in_specs=[
                    x_spec,
                    pl.BlockSpec((KH, KW, Cin, Cout),
                                 lambda n, i: (0, 0, 0, 0)),
                ],
                out_specs=pl.BlockSpec((1, th, W, Cout),
                                       lambda n, i: (n, i, 0, 0)),
            ),
            compiler_params=pltpu.CompilerParams(
                dimension_semantics=("parallel", "parallel"),
                vmem_limit_bytes=64 * 1024 * 1024),
        )

    try:
        out_nhwc = build(block_h)(x_pad, w_hwio)
    except Exception:
        # Graceful degradation if this JAX build rejects element-indexed
        # (halo) blocks: one whole padded image per grid step.
        out_nhwc = build(H)(x_pad, w_hwio)

    return jnp.transpose(out_nhwc, (0, 3, 1, 2))      # back to NCHW


if __name__ == "__main__":
    key = jax.random.PRNGKey(0)
    kx, kw_key = jax.random.split(key)

    N, Cin, Cout, H, W, K = 2, 4, 8, 16, 16, 3

    x = jax.random.normal(kx, (N, Cin, H, W), dtype=jnp.float32)
    # Deterministic init mimicking nn.Conv2d's kaiming-uniform fan_in bound.
    fan_in = Cin * K * K
    bound = 1.0 / (fan_in ** 0.5)
    w = jax.random.uniform(kw_key, (Cout, Cin, K, K), dtype=jnp.float32,
                           minval=-bound, maxval=bound)

    # f32, dilation=1, H tiled into 2 halo'd blocks of 8 rows.
    out = jax.block_until_ready(conv_norelu_forward(x, w, block_h=8))
    ref = jax.lax.conv_general_dilated(
        x, w, window_strides=(1, 1), padding=((1, 1), (1, 1)),
        dimension_numbers=("NCHW", "OIHW", "NCHW"))
    assert out.shape == (N, Cout, H, W)
    assert jnp.allclose(out, ref, atol=1e-4, rtol=1e-4), "mismatch (f32, d=1)"

    # dilation=2 (padding=2), still H-tiled, vs the XLA reference.
    out_d2 = jax.block_until_ready(
        conv_norelu_forward(x, w, dilation=2, block_h=8))
    ref_d2 = jax.lax.conv_general_dilated(
        x, w, window_strides=(1, 1), padding=((2, 2), (2, 2)),
        rhs_dilation=(2, 2), dimension_numbers=("NCHW", "OIHW", "NCHW"))
    assert jnp.allclose(out_d2, ref_d2, atol=1e-4, rtol=1e-4), \
        "mismatch (f32, d=2)"

    # bf16 MXU inputs, f32 accumulation (memory-bound fast path on v6e/v7x).
    out_bf16 = jax.block_until_ready(
        conv_norelu_forward(x, w, compute_dtype=jnp.bfloat16))
    assert jnp.allclose(out_bf16.astype(jnp.float32), ref,
                        atol=5e-2, rtol=5e-2), "mismatch (bf16)"

    print("KERNEL_OK")
</pallas_src>

<mosaic_0001>
module attributes {stable_mosaic.version = 11 : i64} {
  func.func @_conv_kernel(%arg0: i32, %arg1: i32, %arg2: memref<1x18x18x4xf32, #tpu.memory_space<vmem>>, %arg3: memref<3x3x4x8xf32, #tpu.memory_space<vmem>>, %arg4: memref<1x16x16x8xf32, #tpu.memory_space<vmem>>) attributes {dimension_semantics = [#tpu.dimension_semantics<parallel>, #tpu.dimension_semantics<parallel>], iteration_bounds = array<i64: 2, 1>, scalar_prefetch = 0 : i64, scratch_operands = 0 : i64, tpu.core_type = #tpu.core_type<tc>, window_params = [{transform_indices = @transform_0, window_bounds = array<i64: 1, 18, 18, 4>}, {pipeline_mode = #tpu.pipeline_mode<synchronous>, transform_indices = @transform_1, window_bounds = array<i64: 3, 3, 4, 8>}, {transform_indices = @transform_2, window_bounds = array<i64: 1, 16, 16, 8>}]} {
    %c0 = arith.constant 0 : index
    %c0_0 = arith.constant 0 : index
    %c0_1 = arith.constant 0 : index
    %c0_2 = arith.constant 0 : index
    %0 = vector.load %arg2[%c0, %c0_0, %c0_1, %c0_2] : memref<1x18x18x4xf32, #tpu.memory_space<vmem>>, vector<1x18x18x4xf32>
    %1 = vector.shape_cast %0 : vector<1x18x18x4xf32> to vector<18x18x4xf32>
    %2 = vector.extract_strided_slice %1 {offsets = [0, 0, 0], sizes = [18, 16, 4], strides = [1, 1, 1]} : vector<18x18x4xf32> to vector<18x16x4xf32>
    %3 = vector.extract_strided_slice %1 {offsets = [0, 1, 0], sizes = [18, 16, 4], strides = [1, 1, 1]} : vector<18x18x4xf32> to vector<18x16x4xf32>
    %4 = vector.extract_strided_slice %1 {offsets = [0, 2, 0], sizes = [18, 16, 4], strides = [1, 1, 1]} : vector<18x18x4xf32> to vector<18x16x4xf32>
    %cst = arith.constant 0.000000e+00 : f32
    %5 = vector.broadcast %cst : f32 to vector<16x16x8xf32>
    %6 = vector.extract_strided_slice %2 {offsets = [0, 0, 0], sizes = [16, 16, 4], strides = [1, 1, 1]} : vector<18x16x4xf32> to vector<16x16x4xf32>
    %c0_3 = arith.constant 0 : index
    %c0_4 = arith.constant 0 : index
    %c0_5 = arith.constant 0 : index
    %c0_6 = arith.constant 0 : index
    %7 = vector.load %arg3[%c0_3, %c0_4, %c0_5, %c0_6] : memref<3x3x4x8xf32, #tpu.memory_space<vmem>>, vector<1x1x4x8xf32>
    %8 = vector.shape_cast %7 : vector<1x1x4x8xf32> to vector<4x8xf32>
    %cst_7 = arith.constant dense<0.000000e+00> : vector<16x16x8xf32>
    %9 = tpu.matmul %6, %8, %cst_7 {dimension_numbers = #tpu.dot_dimension_numbers<[2], [0], [0, 1], [1], [0, 0, 0, 1, 1, 1], [], []>} : vector<16x16x4xf32>, vector<4x8xf32>, vector<16x16x8xf32> -> vector<16x16x8xf32>
    %10 = arith.addf %5, %9 : vector<16x16x8xf32>
    %11 = vector.extract_strided_slice %3 {offsets = [0, 0, 0], sizes = [16, 16, 4], strides = [1, 1, 1]} : vector<18x16x4xf32> to vector<16x16x4xf32>
    %c0_8 = arith.constant 0 : index
    %c1 = arith.constant 1 : index
    %c0_9 = arith.constant 0 : index
    %c0_10 = arith.constant 0 : index
    %12 = vector.load %arg3[%c0_8, %c1, %c0_9, %c0_10] : memref<3x3x4x8xf32, #tpu.memory_space<vmem>>, vector<1x1x4x8xf32>
    %13 = vector.shape_cast %12 : vector<1x1x4x8xf32> to vector<4x8xf32>
    %cst_11 = arith.constant dense<0.000000e+00> : vector<16x16x8xf32>
    %14 = tpu.matmul %11, %13, %cst_11 {dimension_numbers = #tpu.dot_dimension_numbers<[2], [0], [0, 1], [1], [0, 0, 0, 1, 1, 1], [], []>} : vector<16x16x4xf32>, vector<4x8xf32>, vector<16x16x8xf32> -> vector<16x16x8xf32>
    %15 = arith.addf %10, %14 : vector<16x16x8xf32>
    %16 = vector.extract_strided_slice %4 {offsets = [0, 0, 0], sizes = [16, 16, 4], strides = [1, 1, 1]} : vector<18x16x4xf32> to vector<16x16x4xf32>
    %c0_12 = arith.constant 0 : index
    %c2 = arith.constant 2 : index
    %c0_13 = arith.constant 0 : index
    %c0_14 = arith.constant 0 : index
    %17 = vector.load %arg3[%c0_12, %c2, %c0_13, %c0_14] : memref<3x3x4x8xf32, #tpu.memory_space<vmem>>, vector<1x1x4x8xf32>
    %18 = vector.shape_cast %17 : vector<1x1x4x8xf32> to vector<4x8xf32>
    %cst_15 = arith.constant dense<0.000000e+00> : vector<16x16x8xf32>
    %19 = tpu.matmul %16, %18, %cst_15 {dimension_numbers = #tpu.dot_dimension_numbers<[2], [0], [0, 1], [1], [0, 0, 0, 1, 1, 1], [], []>} : vector<16x16x4xf32>, vector<4x8xf32>, vector<16x16x8xf32> -> vector<16x16x8xf32>
    %20 = arith.addf %15, %19 : vector<16x16x8xf32>
    %21 = vector.extract_strided_slice %2 {offsets = [1, 0, 0], sizes = [16, 16, 4], strides = [1, 1, 1]} : vector<18x16x4xf32> to vector<16x16x4xf32>
    %c1_16 = arith.constant 1 : index
    %c0_17 = arith.constant 0 : index
    %c0_18 = arith.constant 0 : index
    %c0_19 = arith.constant 0 : index
    %22 = vector.load %arg3[%c1_16, %c0_17, %c0_18, %c0_19] : memref<3x3x4x8xf32, #tpu.memory_space<vmem>>, vector<1x1x4x8xf32>
    %23 = vector.shape_cast %22 : vector<1x1x4x8xf32> to vector<4x8xf32>
    %cst_20 = arith.constant dense<0.000000e+00> : vector<16x16x8xf32>
    %24 = tpu.matmul %21, %23, %cst_20 {dimension_numbers = #tpu.dot_dimension_numbers<[2], [0], [0, 1], [1], [0, 0, 0, 1, 1, 1], [], []>} : vector<16x16x4xf32>, vector<4x8xf32>, vector<16x16x8xf32> -> vector<16x16x8xf32>
    %25 = arith.addf %20, %24 : vector<16x16x8xf32>
    %26 = vector.extract_strided_slice %3 {offsets = [1, 0, 0], sizes = [16, 16, 4], strides = [1, 1, 1]} : vector<18x16x4xf32> to vector<16x16x4xf32>
    %c1_21 = arith.constant 1 : index
    %c1_22 = arith.constant 1 : index
    %c0_23 = arith.constant 0 : index
    %c0_24 = arith.constant 0 : index
    %27 = vector.load %arg3[%c1_21, %c1_22, %c0_23, %c0_24] : memref<3x3x4x8xf32, #tpu.memory_space<vmem>>, vector<1x1x4x8xf32>
    %28 = vector.shape_cast %27 : vector<1x1x4x8xf32> to vector<4x8xf32>
    %cst_25 = arith.constant dense<0.000000e+00> : vector<16x16x8xf32>
    %29 = tpu.matmul %26, %28, %cst_25 {dimension_numbers = #tpu.dot_dimension_numbers<[2], [0], [0, 1], [1], [0, 0, 0, 1, 1, 1], [], []>} : vector<16x16x4xf32>, vector<4x8xf32>, vector<16x16x8xf32> -> vector<16x16x8xf32>
    %30 = arith.addf %25, %29 : vector<16x16x8xf32>
    %31 = vector.extract_strided_slice %4 {offsets = [1, 0, 0], sizes = [16, 16, 4], strides = [1, 1, 1]} : vector<18x16x4xf32> to vector<16x16x4xf32>
    %c1_26 = arith.constant 1 : index
    %c2_27 = arith.constant 2 : index
    %c0_28 = arith.constant 0 : index
    %c0_29 = arith.constant 0 : index
    %32 = vector.load %arg3[%c1_26, %c2_27, %c0_28, %c0_29] : memref<3x3x4x8xf32, #tpu.memory_space<vmem>>, vector<1x1x4x8xf32>
    %33 = vector.shape_cast %32 : vector<1x1x4x8xf32> to vector<4x8xf32>
    %cst_30 = arith.constant dense<0.000000e+00> : vector<16x16x8xf32>
    %34 = tpu.matmul %31, %33, %cst_30 {dimension_numbers = #tpu.dot_dimension_numbers<[2], [0], [0, 1], [1], [0, 0, 0, 1, 1, 1], [], []>} : vector<16x16x4xf32>, vector<4x8xf32>, vector<16x16x8xf32> -> vector<16x16x8xf32>
    %35 = arith.addf %30, %34 : vector<16x16x8xf32>
    %36 = vector.extract_strided_slice %2 {offsets = [2, 0, 0], sizes = [16, 16, 4], strides = [1, 1, 1]} : vector<18x16x4xf32> to vector<16x16x4xf32>
    %c2_31 = arith.constant 2 : index
    %c0_32 = arith.constant 0 : index
    %c0_33 = arith.constant 0 : index
    %c0_34 = arith.constant 0 : index
    %37 = vector.load %arg3[%c2_31, %c0_32, %c0_33, %c0_34] : memref<3x3x4x8xf32, #tpu.memory_space<vmem>>, vector<1x1x4x8xf32>
    %38 = vector.shape_cast %37 : vector<1x1x4x8xf32> to vector<4x8xf32>
    %cst_35 = arith.constant dense<0.000000e+00> : vector<16x16x8xf32>
    %39 = tpu.matmul %36, %38, %cst_35 {dimension_numbers = #tpu.dot_dimension_numbers<[2], [0], [0, 1], [1], [0, 0, 0, 1, 1, 1], [], []>} : vector<16x16x4xf32>, vector<4x8xf32>, vector<16x16x8xf32> -> vector<16x16x8xf32>
    %40 = arith.addf %35, %39 : vector<16x16x8xf32>
    %41 = vector.extract_strided_slice %3 {offsets = [2, 0, 0], sizes = [16, 16, 4], strides = [1, 1, 1]} : vector<18x16x4xf32> to vector<16x16x4xf32>
    %c2_36 = arith.constant 2 : index
    %c1_37 = arith.constant 1 : index
    %c0_38 = arith.constant 0 : index
    %c0_39 = arith.constant 0 : index
    %42 = vector.load %arg3[%c2_36, %c1_37, %c0_38, %c0_39] : memref<3x3x4x8xf32, #tpu.memory_space<vmem>>, vector<1x1x4x8xf32>
    %43 = vector.shape_cast %42 : vector<1x1x4x8xf32> to vector<4x8xf32>
    %cst_40 = arith.constant dense<0.000000e+00> : vector<16x16x8xf32>
    %44 = tpu.matmul %41, %43, %cst_40 {dimension_numbers = #tpu.dot_dimension_numbers<[2], [0], [0, 1], [1], [0, 0, 0, 1, 1, 1], [], []>} : vector<16x16x4xf32>, vector<4x8xf32>, vector<16x16x8xf32> -> vector<16x16x8xf32>
    %45 = arith.addf %40, %44 : vector<16x16x8xf32>
    %46 = vector.extract_strided_slice %4 {offsets = [2, 0, 0], sizes = [16, 16, 4], strides = [1, 1, 1]} : vector<18x16x4xf32> to vector<16x16x4xf32>
    %c2_41 = arith.constant 2 : index
    %c2_42 = arith.constant 2 : index
    %c0_43 = arith.constant 0 : index
    %c0_44 = arith.constant 0 : index
    %47 = vector.load %arg3[%c2_41, %c2_42, %c0_43, %c0_44] : memref<3x3x4x8xf32, #tpu.memory_space<vmem>>, vector<1x1x4x8xf32>
    %48 = vector.shape_cast %47 : vector<1x1x4x8xf32> to vector<4x8xf32>
    %cst_45 = arith.constant dense<0.000000e+00> : vector<16x16x8xf32>
    %49 = tpu.matmul %46, %48, %cst_45 {dimension_numbers = #tpu.dot_dimension_numbers<[2], [0], [0, 1], [1], [0, 0, 0, 1, 1, 1], [], []>} : vector<16x16x4xf32>, vector<4x8xf32>, vector<16x16x8xf32> -> vector<16x16x8xf32>
    %50 = arith.addf %45, %49 : vector<16x16x8xf32>
    %c0_46 = arith.constant 0 : index
    %c0_47 = arith.constant 0 : index
    %c0_48 = arith.constant 0 : index
    %c0_49 = arith.constant 0 : index
    %51 = vector.load %arg4[%c0_46, %c0_47, %c0_48, %c0_49] : memref<1x16x16x8xf32, #tpu.memory_space<vmem>>, vector<1x16x16x8xf32>
    %52 = vector.shape_cast %51 : vector<1x16x16x8xf32> to vector<16x16x8xf32>
    %53 = vector.shape_cast %50 : vector<16x16x8xf32> to vector<1x16x16x8xf32>
    tpu.vector_store %arg4[%c0_46, %c0_47, %c0_48, %c0_49], %53 {strides = array<i32>} : memref<1x16x16x8xf32, #tpu.memory_space<vmem>>, vector<1x16x16x8xf32>,
    return
  }
  func.func @transform_0(%arg0: i32, %arg1: i32) -> (i32, i32, i32, i32) {
    %c0_i32 = arith.constant 0 : i32
    %c0_i32_0 = arith.constant 0 : i32
    %c0_i32_1 = arith.constant 0 : i32
    %c0_i32_2 = arith.constant 0 : i32
    return %arg0, %c0_i32, %c0_i32_0, %c0_i32_1 : i32, i32, i32, i32
  }
  func.func @transform_1(%arg0: i32, %arg1: i32) -> (i32, i32, i32, i32) {
    %c0_i32 = arith.constant 0 : i32
    %c0_i32_0 = arith.constant 0 : i32
    %c0_i32_1 = arith.constant 0 : i32
    %c0_i32_2 = arith.constant 0 : i32
    %c0_i32_3 = arith.constant 0 : i32
    return %c0_i32, %c0_i32_0, %c0_i32_1, %c0_i32_2 : i32, i32, i32, i32
  }
  func.func @transform_2(%arg0: i32, %arg1: i32) -> (i32, i32, i32, i32) {
    %c0_i32 = arith.constant 0 : i32
    %c0_i32_0 = arith.constant 0 : i32
    %c0_i32_1 = arith.constant 0 : i32
    return %arg0, %arg1, %c0_i32, %c0_i32_0 : i32, i32, i32, i32
  }
}

</mosaic_0001>

<bundles_post_ra>
// kernel: tpu_custom_call.1
= control target key start
LH: loop header
LB: loop body
LE: loop exit
PB: predicated region body
PF: predicated region fallthrough
CT: control target
= control target key end

     0   :  { %7 = vsyncpa [#allocation3], 0  ;;  %s6065_s0 = inlined_call_operand.hbm [shape: f32[2,18,18,4], index: 0, kind: input, shape index: {}]   ;;  %s6066_s1 = inlined_call_operand.hbm [shape: f32[3,3,4,8], index: 1, kind: input, shape index: {}]   ;;  %s6067_s2 = inlined_call_operand.hbm [shape: f32[2,16,16,8], index: 2, kind: output, shape index: {}]  }
   0x1   :  { %9 = vsyncpa [#allocation3 + $0x1], 0 }
   0x2   :  { %10 = vsyncpa [#allocation6], 0 }
   0x3   :  { %11 = vsyncpa [#allocation4], 0 }
   0x4   :  { %13 = vsyncpa [#allocation4 + $0x1], 0  ;;  %s4706_s9 = smov 0   ;;  %s4708_s10 = smov 0  }
   0x5   :  { %s4710_s11 = smov 0   ;;  %s4712_s12 = smov 0  }
   0x6   :  { %s4714_s13 = smov 0   ;;  %s4716_s14 = smov 0  }
   0x7 LB: > { %s3137_s15 = sadd.s32 4294967295, %s4680_s14   ;;  %s3138_s16 = sadd.s32 4294967294, %s4680_s14   ;;  %s4680_s14 = sphi %s4716_s14, %s19_s14   ;;  %s4676_s13 = sphi %s4714_s13, %s6264_s13   ;;  %s4672_s12 = sphi %s4712_s12, %s6263_s12   ;;  %s4668_s11 = sphi %s4710_s11, %s6262_s11   ;;  %s4664_s10 = sphi %s4708_s10, %s6261_s10   ;;  %s4660_s9 = sphi %s4706_s9, %s6260_s9  }
   0x8   : > { %p51_p0 = scmp.ne.s32.totalorder %s4664_s10, %s4660_s9  ;;  %p4740_p1 = scmp.eq.s32.totalorder %s3137_s15, 0 }
   0x9   : > { %p4744_p2 = scmp.eq.s32.totalorder %s3137_s15, 1  ;;  %p104_p3 = scmp.eq.s32.totalorder %s3138_s16, 1 }
   0xa   : > { %s6145_s17 = scalar_select %p4740_p1, 1, 0 }
   0xb   : > { %s6146_s18 = scalar_select %p4744_p2, 1, 0 }
   0xc   : > { %p4750_p4 = por %p4740_p1, %p51_p0  ;;  %p3139_p5 = scmp.ge.s32.totalorder %s4680_s14, 1 }
   0xd   : > { %p4755_p6 = por %p104_p3, %p51_p0  ;;  %p111_p7 = scmp.lt.s32.totalorder %s4680_s14, 3 }
   0xe   : > { %s6147_s19 = scalar_select %p4750_p4, 1, 0 }
   0xf   : > { %s6148_s20 = scalar_select %p4755_p6, 1, 0 }
  0x10   : > { %p4760_p8 = pnand %p3139_p5, %p111_p7  ;;  %s4682_s22 = smov [#allocation5]  }
  0x11   : > { %s123_s23 = sshll.u32 %s4682_s22, 4  ;;  %s31_s25 = sadd.s32 1, %s4676_s13  ;;  %s124_s23 = int_to_ptr.vmem [resolvable:$true] %s123_s23 }
  0x12   : > { %s6149_s21 = scalar_select %p4760_p8, 1, 0 }
  0x13   : > { %p4465_p9 = pneg %p4760_p8  ;;  %s4536_s28 = scalar_lea.hbm %s6066_s1, 576 }
  0x14   : > { %p4537_p12 = scmp.ne.s32.totalorder %s6066_s1, %s4536_s28  ;;  %p4543_p5 = scmp.lt.u32.totalorder %s4536_s28, %s6066_s1 }
  0x15   : > { %p4769_p11 = pnand %p4465_p9, %p4740_p1 }
  0x17   : > { %p4538_p13 = pneg %p4769_p11 }
  0x19   : > { %p4539_p0 = pnand %p4538_p13, %p4537_p12 }
  0x1b   : > { %p4540_p3 = pneg %p4539_p0 }
  0x1d   : > { %p4545_p7 = pnand %p4543_p5, %p4540_p3 }
  0x1f   : > { %4548 = shalt.err (!%p4545_p7)
}
  0x20   : > { %s4549_s5 = scalar_lea.vmem %s124_s23, 576  ;;  %p4557_p1 = scmp.lt.s32.totalorder %s124_s23, %s124_s23 }
  0x21   : > { %p4550_p9 = scmp.ne.s32.totalorder %s124_s23, %s4549_s5  ;;  %p4558_p4 = scmp.lt.s32.totalorder %s4549_s5, %s4549_s5 }
  0x23   : > { %p4552_p10 = pnand %p4550_p9, %p4538_p13  ;;  %p4559_p8 = por %p4558_p4, %p4557_p1 }
  0x25   : > { %p4553_p6 = pneg %p4552_p10 }
  0x27   : > { %p4560_p2 = pnand %p4559_p8, %p4553_p6 }
  0x29   : > { %4563 = shalt.err (!%p4560_p2)
}
  0x2a   : > { %s4683_s6 = smov 64   ;;  %s4684_s7 = smov 4  }
  0x2b   : > { %4468 = dma.hbm_to_vmem [thread:$0]  (!%p4769_p11), %s6066_s1, 576, %s124_s23, [#allocation6], %s4683_s6, %s4683_s6, %s4684_s7  }
  0x2c   : > { %p33_p1 = scmp.ge.s32.totalorder %s31_s25, 2  ;;  %s38_s16 = sadd.s32 1, %s4668_s11 }
  0x2d   : > { %p45_p2 = scmp.ne.s32.totalorder %s4668_s11, %s4664_s10  ;;  %p46_p4 = scmp.eq.s32.totalorder %s4680_s14, 0 }
  0x2e   : > { %s6266_s25 = smov (%p33_p1, %s31_s25), 0  ;;  %p6151_p8 = scmp.ne.s32.totalorder %s6146_s18, 0 }
  0x2f   : > { %p47_p6 = por %p46_p4, %p45_p2  ;;  %s35_s26 = ssub.s32 %s4676_s13, %s6266_s25 }
  0x30   : > { %p4798_p10 = por %p6151_p8, %p45_p2  ;;  %p4478_p12 = scmp.lt.s32.totalorder %s4680_s14, 2 }
  0x31   : > { %p36_p13 = scmp.eq.s32.totalorder %s35_s26, 0  ;;  %s137_s24 = sand.u32 1, %s4668_s11  }
  0x32   : > { %s4454_s27 = smul.u32 432, %s137_s24  ;;  %p4810_p11 = pnand %p4478_p12, %p47_p6 }
  0x33   : > { %s4807_s28 = scalar_select %p36_p13, %s4668_s11, %s38_s16  }
  0x34   : > { %s4455_s23 = smul.u32 6912, %s4676_s13  ;;  %s141_s29 = scalar_lea.vmem [#allocation2], %s4454_s27 }
  0x35   : > { %s148_s30 = sshll.u32 %s141_s29, 4  ;;  %s4821_s6 = scalar_lea.sflag [#allocation3], %s137_s24  ;;  %s4819_s30 = int_to_ptr.vmem [resolvable:$true] %s148_s30 }
  0x36   : > { %s4817_s5 = scalar_lea.hbm %s6065_s0, %s4455_s23  ;;  %p4566_p3 = pneg %p4810_p11 }
  0x37   : > { %s4564_s7 = scalar_lea.hbm %s4817_s5, 6912  ;;  %s4569_s16 = scalar_lea.hbm %s6065_s0, 13824 }
  0x38   : > { %p4565_p0 = scmp.ne.s32.totalorder %s4817_s5, %s4564_s7  ;;  %p4570_p9 = scmp.lt.u32.totalorder %s4817_s5, %s6065_s0 }
  0x39   : > { %p4571_p1 = scmp.lt.u32.totalorder %s4569_s16, %s4564_s7  ;;  %p4573_p4 = scmp.lt.u32.totalorder %s4564_s7, %s4817_s5 }
  0x3a   : > { %p4567_p5 = pnand %p4566_p3, %p4565_p0 }
  0x3b   : > { %p4572_p2 = por %p4571_p1, %p4570_p9 }
  0x3c   : > { %p4568_p7 = pneg %p4567_p5 }
  0x3d   : > { %p4574_p6 = por %p4573_p4, %p4572_p2 }
  0x3f   : > { %p4575_p8 = pnand %p4574_p6, %p4568_p7 }
  0x41   : > { %4578 = shalt.err (!%p4575_p8)
}
  0x42   : > { %s4579_s24 = scalar_lea.vmem %s4819_s30, 6912  ;;  %s4685_s23 = smov [#allocation2]  }
  0x43   : > { %p4580_p12 = scmp.ne.s32.totalorder %s4819_s30, %s4579_s24  ;;  %s4584_s29 = sshll.u32 %s4685_s23, 4  ;;  %s4585_s29 = int_to_ptr.vmem [resolvable:$false] %s4584_s29 }
  0x44   : > { %s4586_s4 = scalar_lea.vmem %s4585_s29, 13824  ;;  %p4587_p5 = scmp.lt.s32.totalorder %s4819_s30, %s4585_s29 }
  0x45   : > { %p4582_p13 = pnand %p4580_p12, %p4566_p3  ;;  %p4588_p9 = scmp.lt.s32.totalorder %s4586_s4, %s4579_s24 }
  0x47   : > { %p4583_p0 = pneg %p4582_p13  ;;  %p4589_p1 = por %p4588_p9, %p4587_p5 }
  0x49   : > { %p4590_p2 = pnand %p4589_p1, %p4583_p0 }
  0x4b   : > { %4593 = shalt.err (!%p4590_p2)
}
  0x4c   : > { %s4686_s18 = smov 128   ;;  %s4687_s7 = smov 8  }
  0x4d   : > { %4472 = dma.hbm_to_vmem [thread:$0]  (!%p4810_p11), %s4817_s5, 6912, %s4819_s30, %s4821_s6, %s4686_s18, %s4686_s18, %s4687_s7  }
  0x4e   : > { %p6154_p3 = scmp.ne.s32.totalorder %s6149_s21, 0 }
  0x50   : > { %160 = sbr.rel (%p6154_p3) target bundleno = 617 (0x269), region = 28 }
  0x57   : > { %s4852_s8 = sand.u32 1, %s4664_s10   ;;  %p6155_p7 = scmp.ne.s32.totalorder %s6147_s19, 0 }
  0x58   : > { %s4456_s15 = smul.u32 432, %s4852_s8  ;;  %s163_s16 = scalar_lea.sflag [#allocation3], %s4852_s8 }
  0x5a   : > { %s4856_s26 = scalar_lea.vmem [#allocation2], %s4456_s15 }
  0x5b   : > { %4647 = dma.done.wait (%p6155_p7), %s163_s16, 6912  }
  0x5c   : > { %4649 = vsyncadd (%p6155_p7), %s163_s16, 4294960384  ;;  %p6156_p11 = scmp.ne.s32.totalorder %s6145_s17, 0 }
  0x5e   : > { %4651 = dma.done.wait (%p6156_p11), [#allocation6], 576  }
  0x5f   : > { %4653 = vsyncadd (%p6156_p11), [#allocation6], 4294966720  ;;  %vm443_vm0 = vcmask 1043456   ;;  %v248_v0 = vld [vmem:[#allocation5 + $0x4] sm:$0xf]  ;;  %vm297_vm1 = vcmask 1046528  }
  0x60   : > { %v4866_v1 = vld [vmem:[#allocation5 + $0x10] sm:$0xf]  ;;  %3746 = vmatprep.subr.msk.mxu1 %vm443_vm0, %v248_v0  ;;  %v4875_v3 = vld [vmem:[%s4856_s26 + $0x8] sm:$0xff]  ;;  %vm378_vm2 = vcmask 31744   ;;  %v246_v5 = vld [vmem:[#allocation5] sm:$0xf] }
  0x61   : > { %v4869_v2 = vld [vmem:[%s4856_s26] sm:$0xff]  ;;  %3946 = vmatprep.subr.msk.mxu0 %vm443_vm0, %v4866_v1  ;;  %v4879_v6 = vld [vmem:[%s4856_s26 + $0x18] sm:$0xff]  ;;  %3747 = vmatpush3.msk.msra.mxu1 %vm443_vm0, %v248_v0  ;;  %v299_v7 = vrot.slane %v4875_v3, 1  ;;  %v4890_v11 = vld [vmem:[%s4856_s26 + $0x30] sm:$0xff]  ;;  %vm966_vm3 = vcmask 1045504   ;;  %s3145_s17 = sshll.u32 %s4852_s8, 8 }
  0x62   : > { %v298_v4 = vrot.slane %v4869_v2, 1  ;;  %6157 = vst [vmem:[#allocation11_spill] sm:$0xff] %v4879_v6  ;;  %3947 = vmatpush3.msk.msra.mxu0 %vm443_vm0, %v4866_v1  ;;  %v4886_v8 = vld [vmem:[%s4856_s26 + $0x20] sm:$0xff]  ;;  %v303_v9 = vrot.slane %v4879_v6, 1  ;;  %3796 = vmatprep.subr.msk.mxu1 %vm443_vm0, %v246_v5  ;;  %v4896_v13 = vld [vmem:[%s4856_s26 + $0x10] sm:$0x3] }
  0x63   : > { %6158 = vst [vmem:[#allocation12_spill] sm:$0xff] %v4886_v8  ;;  %v1912_v10 = vld [vmem:[#allocation5 + $0x14] sm:$0xf]  ;;  %v304_v12 = vrot.slane %v4886_v8, 1  ;;  %v4899_v14 = vld [vmem:[%s4856_s26 + $0x28] sm:$0x3] }
  0x64   : > { %3996 = vmatprep.subr.msk.mxu0 %vm443_vm0, %v1912_v10  ;;  %v4902_v15 = vld [vmem:[%s4856_s26 + $0x38] sm:$0xff]  ;;  %v300_v16 = vsel %vm297_vm1, %v298_v4, %v299_v7  ;;  %v301_v17 = vrot.slane %v4896_v13, 1  ;;  %v306_v18 = vrot.slane %v4899_v14, 1  ;;  %v4908_v19 = vld [vmem:[%s4856_s26 + $0x40] sm:$0x3]  ;;  %v4911_v20 = vld [vmem:[%s4856_s26 + $0x48] sm:$0xff] }
  0x65   : > { %3748 = vmatprep.mubr.msk.f32.mxu1 %vm378_vm2, %v300_v16  ;;  %v305_v21 = vsel %vm297_vm1, %v303_v9, %v304_v12  ;;  %v308_v22 = vrot.slane %v4890_v11, 1  ;;  %v309_v23 = vrot.slane %v4902_v15, 1  ;;  %v4918_v24 = vld [vmem:[%s4856_s26 + $0x50] sm:$0xff]  ;;  %v4921_v25 = vld [vmem:[%s4856_s26 + $0x58] sm:$0x3]  ;;  %v311_v28 = vrot.slane %v4908_v19, 1 }
  0x66   : > { %3948 = vmatprep.mubr.msk.f32.mxu0 %vm378_vm2, %v305_v21  ;;  %v302_v26 = vsel %vm297_vm1, %v299_v7, %v301_v17  ;;  %v307_v27 = vsel %vm297_vm1, %v304_v12, %v306_v18  ;;  %v313_v29 = vrot.slane %v4911_v20, 1  ;;  %v4929_v30 = vld [vmem:[%s4856_s26 + $0x60] sm:$0xff]  ;;  %v4932_v31 = vld [vmem:[%s4856_s26 + $0x68] sm:$0xff]  ;;  %v314_v33 = vrot.slane %v4918_v24, 1  ;;  %v4955_v39 = vld [vmem:[%s4856_s26 + $0x70] sm:$0x3] }
  0x67   : > { %3749 = vmatmul.mubr.msk.f32.vlgmr.msra.gmra.mrb[0].mxu1 %vm378_vm2, %v302_v26  ;;  %3949 = vmatmul.mubr.msk.f32.vlgmr.msra.gmra.mrb[0].mxu0 %vm378_vm2, %v307_v27  ;;  %v4937_v32 = vsel %vm297_vm1, %v308_v22, %v309_v23  ;;  %v4943_v34 = vsel %vm297_vm1, %v309_v23, %v311_v28  ;;  %v316_v35 = vrot.slane %v4921_v25, 1  ;;  %v318_v37 = vrot.slane %v4929_v30, 1  ;;  %v4958_v40 = vld [vmem:[%s4856_s26 + $0x78] sm:$0xff]  ;;  %v4961_v41 = vld [vmem:[%s4856_s26 + $0x80] sm:$0xff]  ;;  %v4982_v48 = vld [vmem:[%s4856_s26 + $0x88] sm:$0x3] }
  0x68   : > { %6159 = vst [vmem:[#allocation13_spill] sm:$0xff] %v4937_v32  ;;  %3797 = vmatpush3.msk.msra.mxu1 %vm443_vm0, %v246_v5  ;;  %3997 = vmatpush3.msk.msra.mxu0 %vm443_vm0, %v1912_v10  ;;  %6160 = vst [vmem:[#allocation14_spill] sm:$0xff] %v4943_v34  ;;  %v4950_v36 = vsel %vm297_vm1, %v313_v29, %v314_v33  ;;  %v319_v38 = vrot.slane %v4932_v31, 1  ;;  %v4966_v42 = vld [vmem:[#allocation5 + $0x18] sm:$0xf]  ;;  %v321_v44 = vrot.slane %v4955_v39, 1 }
  0x69   : > { %3751 = vmatprep.mubr.msk.f32.mxu1 %vm378_vm2, %v305_v21  ;;  %3951 = vmatprep.mubr.msk.f32.mxu0 %vm378_vm2, %v4937_v32  ;;  %6161 = vst [vmem:[#allocation15_spill] sm:$0xff] %v4950_v36  ;;  %v4973_v43 = vsel %vm297_vm1, %v314_v33, %v316_v35  ;;  %v323_v46 = vrot.slane %v4958_v40, 1  ;;  %v324_v47 = vrot.slane %v4961_v41, 1  ;;  %v4987_v49 = vld [vmem:[%s4856_s26 + $0x90] sm:$0xff]  ;;  %v4990_v50 = vld [vmem:[%s4856_s26 + $0x98] sm:$0xff]  ;;  %v326_v52 = vrot.slane %v4982_v48, 1 }
  0x6a   : > { %6162 = vst [vmem:[#allocation16_spill] sm:$0xff] %v4973_v43  ;;  %v4977_v45 = vsel %vm297_vm1, %v318_v37, %v319_v38  ;;  %4046 = vmatprep.subr.msk.mxu0 %vm443_vm0, %v4966_v42  ;;  %v5001_v51 = vsel %vm297_vm1, %v319_v38, %v321_v44  ;;  %v328_v54 = vrot.slane %v4987_v49, 1  ;;  %v329_v55 = vrot.slane %v4990_v50, 1  ;;  %v5010_v56 = vld [vmem:[%s4856_s26 + $0xa0] sm:$0x3]  ;;  %v5013_v57 = vld [vmem:[%s4856_s26 + $0xa8] sm:$0xff] }
  0x6b   : > { %3752 = vmatmul.mubr.msk.f32.gmra.mrb[2].mxu1 %vm378_vm2, %v307_v27  ;;  %3952 = vmatmul.mubr.msk.f32.gmra.mrb[2].mxu0 %vm378_vm2, %v4943_v34  ;;  %6163 = vst [vmem:[#allocation17_spill] sm:$0xff] %v4977_v45  ;;  %6164 = vst [vmem:[#allocation18_spill] sm:$0xff] %v5001_v51  ;;  %v5005_v53 = vsel %vm297_vm1, %v323_v46, %v324_v47  ;;  %v5016_v58 = vld [vmem:[%s4856_s26 + $0xb0] sm:$0xff]  ;;  %v5027_v59 = vsel %vm297_vm1, %v324_v47, %v326_v52  ;;  %v331_v60 = vrot.slane %v5010_v56, 1  ;;  %v5030_v61 = vld [vmem:[#allocation5 + $0x8] sm:$0xf] }
  0x6c   : > { %3754 = vmatprep.mubr.msk.f32.mxu1 %vm378_vm2, %v4937_v32  ;;  %3954 = vmatprep.mubr.msk.f32.mxu0 %vm378_vm2, %v4950_v36  ;;  %6165 = vst [vmem:[#allocation19_spill] sm:$0xff] %v5005_v53  ;;  %6166 = vst [vmem:[#allocation20_spill] sm:$0xff] %v5027_v59  ;;  %v5033_v62 = vsel %vm297_vm1, %v328_v54, %v329_v55  ;;  %v333_v63 = vrot.slane %v5013_v57, 1  ;;  %v334_v0 = vrot.slane %v5016_v58, 1  ;;  %v5038_v4 = vld [vmem:[%s4856_s26 + $0xb8] sm:$0x3] }
  0x6d   : > { %6167 = vst [vmem:[#allocation21_spill] sm:$0xff] %v5033_v62  ;;  %3846 = vmatprep.subr.msk.mxu1 %vm443_vm0, %v5030_v61  ;;  %v5043_v5 = vld [vmem:[%s4856_s26 + $0xc0] sm:$0xff]  ;;  %v5046_v7 = vld [vmem:[%s4856_s26 + $0xc8] sm:$0xff]  ;;  %v5057_v9 = vsel %vm297_vm1, %v329_v55, %v331_v60  ;;  %v336_v10 = vrot.slane %v5038_v4, 1  ;;  %v5066_v18 = vld [vmem:[%s4856_s26 + $0xd0] sm:$0x3] }
  0x6e   : > { %6168 = vst [vmem:[#allocation22_spill] sm:$0xff] %v5057_v9  ;;  %v5061_v12 = vsel %vm297_vm1, %v333_v63, %v334_v0  ;;  %v338_v16 = vrot.slane %v5043_v5, 1  ;;  %v339_v17 = vrot.slane %v5046_v7, 1  ;;  %v341_v22 = vrot.slane %v5066_v18, 1  ;;  %v5086_v28 = vld [vmem:[%s4856_s26 + $0xd8] sm:$0xff]  ;;  %v5089_v29 = vld [vmem:[%s4856_s26 + $0xe0] sm:$0xff] }
  0x6f   : > { %3755 = vmatmul.mubr.msk.f32.gmra.mrb[4].mxu1 %vm378_vm2, %v4943_v34  ;;  %3955 = vmatmul.mubr.msk.f32.gmra.mrb[4].mxu0 %vm378_vm2, %v4973_v43  ;;  %6169 = vst [vmem:[#allocation23_spill] sm:$0xff] %v5061_v12  ;;  %v5077_v21 = vsel %vm297_vm1, %v334_v0, %v336_v10  ;;  %v972_v26 = vrot.slane %v4879_v6, 2  ;;  %v973_v27 = vrot.slane %v4886_v8, 2  ;;  %v975_v33 = vrot.slane %v4899_v14, 2  ;;  %v5104_v37 = vld [vmem:[%s4856_s26 + $0xe8] sm:$0x3] }
  0x70   : > { %3757 = vmatprep.mubr.msk.f32.mxu1 %vm378_vm2, %v4950_v36  ;;  %3957 = vmatprep.mubr.msk.f32.mxu0 %vm378_vm2, %v4977_v45  ;;  %6170 = vst [vmem:[#allocation24_spill] sm:$0xff] %v5077_v21  ;;  %v5081_v23 = vsel %vm297_vm1, %v338_v16, %v339_v17  ;;  %v5101_v35 = vsel %vm297_vm1, %v339_v17, %v341_v22  ;;  %v343_v14 = vrot.slane %v5086_v28, 1  ;;  %v344_v44 = vrot.slane %v5089_v29, 1  ;;  %v5112_v46 = vld [vmem:[%s4856_s26 + $0xf0] sm:$0xff]  ;;  %v5115_v47 = vld [vmem:[%s4856_s26 + $0xf8] sm:$0xff]  ;;  %s5943_s19 = scalar_lea.vmem [#allocation7], %s3145_s17 }
  0x71   : > { %6171 = vst [vmem:[#allocation25_spill] sm:$0xff] %v5081_v23  ;;  %6172 = vst [vmem:[#allocation26_spill] sm:$0xff] %v5101_v35  ;;  %v5107_v38 = vsel %vm966_vm3, %v972_v26, %v973_v27  ;;  %v977_v52 = vrot.slane %v4890_v11, 2  ;;  %v978_v54 = vrot.slane %v4902_v15, 2  ;;  %v5124_v55 = vsel %vm966_vm3, %v973_v27, %v975_v33  ;;  %v5137_v22 = vld [vmem:[%s4856_s26 + $0x100] sm:$0x3] }
  0x72   : > { %v346_v60 = vrot.slane %v5104_v37, 1  ;;  %v980_v63 = vrot.slane %v4908_v19, 2  ;;  %v348_v0 = vrot.slane %v5112_v46, 1  ;;  %v349_v10 = vrot.slane %v5115_v47, 1  ;;  %v5146_v27 = vld [vmem:[%s4856_s26 + $0x108] sm:$0xff]  ;;  %v5149_v33 = vld [vmem:[%s4856_s26 + $0x110] sm:$0xff] }
  0x73   : > { %3758 = vmatmul.mubr.msk.f32.gmra.mrb[6].mxu1 %vm378_vm2, %v4973_v43  ;;  %3958 = vmatmul.mubr.msk.f32.gmra.mrb[6].mxu0 %vm378_vm2, %v5001_v51  ;;  %v982_v16 = vrot.slane %v4911_v20, 2  ;;  %v983_v17 = vrot.slane %v4918_v24, 2  ;;  %v5140_v26 = vsel %vm297_vm1, %v343_v14, %v344_v44  ;;  %v5143_v19 = vsel %vm966_vm3, %v977_v52, %v978_v54  ;;  %v5257_v32 = vld [vmem:[%s4856_s26 + $0x150] sm:$0xff]  ;;  %s3448_s21 = sshll.u32 %s4672_s12, 12  ;;  %s3043_s30 = sshll.u32 %s5943_s19, 4  ;;  %s6012_s30 = int_to_ptr.vmem [resolvable:$true] %s3043_s30 }
  0x74   : > { %3760 = vmatprep.mubr.msk.f32.mxu1 %vm378_vm2, %v4977_v45  ;;  %3960 = vmatprep.mubr.msk.f32.mxu0 %vm378_vm2, %v5005_v53  ;;  %6173 = vst [vmem:[#allocation27_spill] sm:$0xff] %v5140_v26  ;;  %v5158_v14 = vsel %vm297_vm1, %v344_v44, %v346_v60  ;;  %v351_v52 = vrot.slane %v5137_v22, 1  ;;  %v5176_v44 = vld [vmem:[%s4856_s26 + $0x118] sm:$0x3]  ;;  %v987_v60 = vrot.slane %v4929_v30, 2  ;;  %v998_v34 = vrot.slane %v4990_v50, 2  ;;  %s6010_s6 = scalar_lea.hbm %s6067_s2, %s3448_s21 }
  0x75   : > { %6174 = vst [vmem:[#allocation28_spill] sm:$0xff] %v5158_v14  ;;  %vm2993_vm4 = vcmask 64512   ;;  %s3027_s12 = scalar_lea.sflag [#allocation4], %s4852_s8  ;;  %s4594_s27 = scalar_lea.vmem %s6012_s30, 4096 }
  0x76   : > { %p4595_p4 = scmp.ne.s32.totalorder %s6012_s30, %s4594_s27  ;;  %s4688_s24 = smov [#allocation7]  }
  0x77   : > { %3761 = vmatmul.mubr.msk.f32.gmra.mrb[8].mxu1 %vm378_vm2, %v5001_v51  ;;  %3961 = vmatmul.mubr.msk.f32.gmra.mrb[8].mxu0 %vm378_vm2, %v5027_v59  ;;  %v5225_v51 = vld [vmem:[%s4856_s26 + $0x140] sm:$0xff]  ;;  %s4598_s23 = sshll.u32 %s4688_s24, 4  ;;  %s4599_s23 = int_to_ptr.vmem [resolvable:$false] %s4598_s23 }
  0x78   : > { %3763 = vmatprep.mubr.msk.f32.mxu1 %vm378_vm2, %v5005_v53  ;;  %3963 = vmatprep.mubr.msk.f32.mxu0 %vm378_vm2, %v5033_v62  ;;  %p4596_p6 = pnand %p4595_p4, %p4798_p10  ;;  %s4600_s29 = scalar_lea.vmem %s4599_s23, 8192 }
  0x79   : > { %p4601_p12 = scmp.lt.s32.totalorder %s6012_s30, %s4599_s23  ;;  %p4602_p13 = scmp.lt.s32.totalorder %s4600_s29, %s4594_s27 }
  0x7a   : > { %p4597_p8 = pneg %p4596_p6 }
  0x7b   : > { %3764 = vmatmul.mubr.msk.f32.gmra.mrb[10].mxu1 %vm378_vm2, %v5027_v59  ;;  %3964 = vmatmul.mubr.msk.f32.gmra.mrb[10].mxu0 %vm378_vm2, %v5057_v9  ;;  %v990_v59 = vrot.slane %v4955_v39, 2  ;;  %p4603_p0 = por %p4602_p13, %p4601_p12 }
  0x7c   : > { %3766 = vmatprep.mubr.msk.f32.mxu1 %vm378_vm2, %v5033_v62  ;;  %3966 = vmatprep.mubr.msk.f32.mxu0 %vm378_vm2, %v5061_v12  ;;  %v356_v62 = vrot.slane %v5176_v44, 1 }
  0x7d   : > { %p4604_p5 = pnand %p4603_p0, %p4597_p8 }
  0x7f   : > { %3767 = vmatmul.mubr.msk.f32.gmra.mrb[12].mxu1 %vm378_vm2, %v5057_v9  ;;  %3967 = vmatmul.mubr.msk.f32.gmra.mrb[12].mxu0 %vm378_vm2, %v5077_v21  ;;  %v5173_v9 = vsel %vm966_vm3, %v982_v16, %v983_v17  ;;  %v5197_v16 = vsel %vm297_vm1, %v349_v10, %v351_v52  ;;  %v993_v52 = vrot.slane %v4961_v41, 2 }
  0x80   : > { %3769 = vmatprep.mubr.msk.f32.mxu1 %vm378_vm2, %v5061_v12  ;;  %3969 = vmatprep.mubr.msk.f32.mxu0 %vm378_vm2, %v5081_v23  ;;  %v5170_v12 = vsel %vm297_vm1, %v348_v0, %v349_v10  ;;  %6176 = vst [vmem:[#allocation30_spill] sm:$0xff] %v5173_v9  ;;  %v5188_v0 = vld [vmem:[%s4856_s26 + $0x128] sm:$0xff]  ;;  %6177 = vst [vmem:[#allocation31_spill] sm:$0xff] %v5197_v16  ;;  %v992_v10 = vrot.slane %v4958_v40, 2 }
  0x81   : > { %6175 = vst [vmem:[#allocation29_spill] sm:$0xff] %v5170_v12  ;;  %v359_v53 = vrot.slane %v5188_v0, 1 }
  0x82   : > { %v5247_v36 = vsel %vm966_vm3, %v992_v10, %v993_v52 }
  0x83   : > { %3770 = vmatmul.mubr.msk.f32.gmra.mrb[14].mxu1 %vm378_vm2, %v5077_v21  ;;  %3970 = vmatmul.mubr.msk.f32.gmra.mrb[14].mxu0 %vm378_vm2, %v5101_v35  ;;  %v985_v21 = vrot.slane %v4921_v25, 2  ;;  %v353_v25 = vrot.slane %v5146_v27, 1  ;;  %6184 = vst [vmem:[#allocation38_spill] sm:$0xff] %v5247_v36 }
  0x84   : > { %3772 = vmatprep.mubr.msk.f32.mxu1 %vm378_vm2, %v5081_v23  ;;  %3998 = vmatprep.mubr.msk.f32.mxu0 %vm378_vm2, %v5107_v38  ;;  %v5151_v23 = vld [vmem:[#allocation5 + $0x1c] sm:$0xf] }
  0x87   : > { %3773 = vmatmul.mubr.msk.f32.gmra.mrb[16].mxu1 %vm378_vm2, %v5101_v35  ;;  %3999 = vmatmul.mubr.msk.f32.vlgmr.msra.gmra.mrb[0].mxu0 %vm378_vm2, %v5124_v55  ;;  %v5167_v35 = vsel %vm966_vm3, %v978_v54, %v980_v63  ;;  %v988_v54 = vrot.slane %v4932_v31, 2  ;;  %v5185_v63 = vld [vmem:[%s4856_s26 + $0x120] sm:$0xff] }
  0x88   : > { %4047 = vmatpush3.msk.msra.mxu0 %vm443_vm0, %v4966_v42  ;;  %3775 = vmatprep.mubr.msk.f32.mxu1 %vm378_vm2, %v5140_v26  ;;  %v354_v42 = vrot.slane %v5149_v33, 1  ;;  %v5200_v26 = vsel %vm966_vm3, %v983_v17, %v985_v21  ;;  %v5213_v21 = vld [vmem:[%s4856_s26 + $0x130] sm:$0x3] }
  0x89   : > { %4001 = vmatprep.mubr.msk.f32.mxu0 %vm378_vm2, %v5143_v19  ;;  %4096 = vmatprep.subr.msk.mxu0 %vm443_vm0, %v5151_v23  ;;  %6178 = vst [vmem:[#allocation32_spill] sm:$0xff] %v5200_v26  ;;  %v5219_v39 = vsel %vm966_vm3, %v987_v60, %v988_v54  ;;  %v995_v60 = vrot.slane %v4982_v48, 2  ;;  %v5241_v43 = vsel %vm966_vm3, %v988_v54, %v990_v59  ;;  %v364_v48 = vrot.slane %v5225_v51, 1  ;;  %v5260_v59 = vld [vmem:[%s4856_s26 + $0x158] sm:$0xff] }
  0x8a   : > { %v5216_v17 = vsel %vm297_vm1, %v353_v25, %v354_v42  ;;  %6180 = vst [vmem:[#allocation34_spill] sm:$0xff] %v5219_v39  ;;  %v5232_v45 = vsel %vm297_vm1, %v354_v42, %v356_v62  ;;  %v361_v25 = vrot.slane %v5213_v21, 1  ;;  %6182 = vst [vmem:[#allocation36_spill] sm:$0xff] %v5241_v43  ;;  %v5250_v62 = vld [vmem:[%s4856_s26 + $0x148] sm:$0x3] }
  0x8b   : > { %3776 = vmatmul.mubr.msk.f32.gmra.mrb[18].mxu1 %vm378_vm2, %v5158_v14  ;;  %4002 = vmatmul.mubr.msk.f32.gmra.mrb[2].mxu0 %vm378_vm2, %v5167_v35  ;;  %v358_v14 = vrot.slane %v5185_v63, 1  ;;  %6179 = vst [vmem:[#allocation33_spill] sm:$0xff] %v5216_v17  ;;  %6181 = vst [vmem:[#allocation35_spill] sm:$0xff] %v5232_v45  ;;  %v5270_v54 = vsel %vm966_vm3, %v993_v52, %v995_v60  ;;  %v366_v10 = vrot.slane %v5250_v62, 1 }
  0x8c   : > { %3778 = vmatprep.mubr.msk.f32.mxu1 %vm378_vm2, %v5170_v12  ;;  %4004 = vmatprep.mubr.msk.f32.mxu0 %vm378_vm2, %v5173_v9  ;;  %v5222_v12 = vld [vmem:[%s4856_s26 + $0x138] sm:$0xff]  ;;  %6186 = vst [vmem:[#allocation40_spill] sm:$0xff] %v5270_v54 }
  0x8d   : > { %v363_v42 = vrot.slane %v5222_v12, 1  ;;  %v5324_v9 = vld [vmem:[%s4856_s26 + $0x178] sm:$0x3] }
  0x8f   : > { %3779 = vmatmul.mubr.msk.f32.gmra.mrb[20].mxu1 %vm378_vm2, %v5197_v16  ;;  %4005 = vmatmul.mubr.msk.f32.gmra.mrb[4].mxu0 %vm378_vm2, %v5200_v26  ;;  %v5244_v16 = vsel %vm297_vm1, %v358_v14, %v359_v53  ;;  %v5267_v14 = vsel %vm297_vm1, %v359_v53, %v361_v25  ;;  %v1002_v53 = vrot.slane %v5013_v57, 2  ;;  %v1003_v25 = vrot.slane %v5016_v58, 2 }
  0x90   : > { %3781 = vmatprep.mubr.msk.f32.mxu1 %vm378_vm2, %v5216_v17  ;;  %4007 = vmatprep.mubr.msk.f32.mxu0 %vm378_vm2, %v5219_v39  ;;  %6183 = vst [vmem:[#allocation37_spill] sm:$0xff] %v5244_v16  ;;  %v997_v17 = vrot.slane %v4987_v49, 2  ;;  %6185 = vst [vmem:[#allocation39_spill] sm:$0xff] %v5267_v14  ;;  %v1000_v39 = vrot.slane %v5010_v56, 2  ;;  %v5283_v52 = vsel %vm297_vm1, %v363_v42, %v364_v48  ;;  %v5289_v56 = vld [vmem:[%s4856_s26 + $0x160] sm:$0x3] }
  0x91   : > { %6187 = vst [vmem:[#allocation41_spill] sm:$0xff] %v5283_v52  ;;  %v5302_v26 = vsel %vm297_vm1, %v364_v48, %v366_v10  ;;  %v1005_v48 = vrot.slane %v5038_v4, 2 }
  0x92   : > { %v5286_v60 = vsel %vm966_vm3, %v997_v17, %v998_v34  ;;  %6190 = vst [vmem:[#allocation44_spill] sm:$0xff] %v5302_v26  ;;  %v5305_v42 = vsel %vm966_vm3, %v998_v34, %v1000_v39  ;;  %v1007_v39 = vrot.slane %v5043_v5, 2 }
  0x93   : > { %3782 = vmatmul.mubr.msk.f32.gmra.mrb[22].mxu1 %vm378_vm2, %v5232_v45  ;;  %4008 = vmatmul.mubr.msk.f32.gmra.mrb[6].mxu0 %vm378_vm2, %v5241_v43  ;;  %v368_v45 = vrot.slane %v5257_v32, 1  ;;  %v369_v43 = vrot.slane %v5260_v59, 1  ;;  %6188 = vst [vmem:[#allocation42_spill] sm:$0xff] %v5286_v60  ;;  %6191 = vst [vmem:[#allocation45_spill] sm:$0xff] %v5305_v42  ;;  %v5338_v4 = vsel %vm966_vm3, %v1003_v25, %v1005_v48  ;;  %v1017_v48 = vrot.slane %v5112_v46, 2 }
  0x94   : > { %3784 = vmatprep.mubr.msk.f32.mxu1 %vm378_vm2, %v5244_v16  ;;  %4010 = vmatprep.mubr.msk.f32.mxu0 %vm378_vm2, %v5247_v36  ;;  %v5292_v16 = vld [vmem:[%s4856_s26 + $0x168] sm:$0xff]  ;;  %v5295_v36 = vld [vmem:[%s4856_s26 + $0x170] sm:$0xff] }
  0x95   : > { %6189 = vst [vmem:[#allocation43_spill] sm:$0xff] %v5295_v36  ;;  %v5312_v17 = vsel %vm297_vm1, %v368_v45, %v369_v43  ;;  %v373_v10 = vrot.slane %v5292_v16, 1  ;;  %v374_v34 = vrot.slane %v5295_v36, 1 }
  0x96   : > { %6192 = vst [vmem:[#allocation46_spill] sm:$0xff] %v5312_v17 }
  0x97   : > { %3785 = vmatmul.mubr.msk.f32.gmra.mrb[24].mxu1 %vm378_vm2, %v5267_v14  ;;  %4011 = vmatmul.mubr.msk.f32.gmra.mrb[8].mxu0 %vm378_vm2, %v5270_v54  ;;  %v5315_v14 = vsel %vm966_vm3, %v1002_v53, %v1003_v25  ;;  %v371_v54 = vrot.slane %v5289_v56, 1  ;;  %v376_v53 = vrot.slane %v5324_v9, 1 }
  0x98   : > { %3787 = vmatprep.mubr.msk.f32.mxu1 %vm378_vm2, %v5283_v52  ;;  %4013 = vmatprep.mubr.msk.f32.mxu0 %vm378_vm2, %v5286_v60  ;;  %6193 = vst [vmem:[#allocation47_spill] sm:$0xff] %v5315_v14  ;;  %v1008_v52 = vrot.slane %v5046_v7, 2  ;;  %v1010_v60 = vrot.slane %v5066_v18, 2 }
  0x99   : > { %v5335_v45 = vsel %vm297_vm1, %v369_v43, %v371_v54  ;;  %v5359_v43 = vsel %vm297_vm1, %v374_v34, %v376_v53  ;;  %v1015_v54 = vrot.slane %v5104_v37, 2 }
  0x9a   : > { %6194 = vst [vmem:[#allocation48_spill] sm:$0xff] %v5335_v45  ;;  %6197 = vst [vmem:[#allocation51_spill] sm:$0xff] %v5359_v43  ;;  %v5362_v18 = vsel %vm966_vm3, %v1008_v52, %v1010_v60  ;;  %v1022_v60 = vrot.slane %v5146_v27, 2 }
  0x9b   : > { %3788 = vmatmul.mubr.msk.f32.gmra.mrb[26].mxu1 %vm378_vm2, %v5302_v26  ;;  %4014 = vmatmul.mubr.msk.f32.gmra.mrb[10].mxu0 %vm378_vm2, %v5305_v42  ;;  %v5343_v26 = vsel %vm297_vm1, %v373_v10, %v374_v34  ;;  %v5346_v42 = vsel %vm966_vm3, %v1007_v39, %v1008_v52  ;;  %v1018_v10 = vrot.slane %v5115_v47, 2  ;;  %v1020_v52 = vrot.slane %v5137_v22, 2  ;;  %v5387_v39 = vld [vmem:[#allocation5 + $0xc] sm:$0xf] }
  0x9c   : > { %3790 = vmatprep.mubr.msk.f32.mxu1 %vm378_vm2, %v5312_v17  ;;  %4016 = vmatprep.mubr.msk.f32.mxu0 %vm378_vm2, %v5315_v14  ;;  %6195 = vst [vmem:[#allocation49_spill] sm:$0xff] %v5343_v26  ;;  %6196 = vst [vmem:[#allocation50_spill] sm:$0xff] %v5346_v42  ;;  %v1012_v17 = vrot.slane %v5086_v28, 2  ;;  %v1013_v14 = vrot.slane %v5089_v29, 2 }
  0x9d   : > { %v5385_v34 = vsel %vm966_vm3, %v1017_v48, %v1018_v10  ;;  %v5398_v22 = vsel %vm966_vm3, %v1018_v10, %v1020_v52  ;;  %v1028_v48 = vrot.slane %v5188_v0, 2  ;;  %v1032_v52 = vrot.slane %v5222_v12, 2 }
  0x9e   : > { %v5366_v25 = vsel %vm966_vm3, %v1012_v17, %v1013_v14  ;;  %v5379_v37 = vsel %vm966_vm3, %v1013_v14, %v1015_v54  ;;  %v1023_v17 = vrot.slane %v5149_v33, 2  ;;  %v1025_v14 = vrot.slane %v5176_v44, 2 }
  0x9f   : > { %3791 = vmatmul.mubr.msk.f32.gmra.mrb[28].mxu1 %vm378_vm2, %v5335_v45  ;;  %4017 = vmatmul.mubr.msk.f32.gmra.mrb[12].mxu0 %vm378_vm2, %v5338_v4  ;;  %v1027_v54 = vrot.slane %v5185_v63, 2  ;;  %v1030_v44 = vrot.slane %v5213_v21, 2  ;;  %v5462_v45 = vld [vmem:[%s4856_s26 + $0x180] sm:$0xff] }
  0xa0   : > { %3793 = vmatprep.mubr.msk.f32.mxu1 %vm378_vm2, %v5343_v26  ;;  %4019 = vmatprep.mubr.msk.f32.mxu0 %vm378_vm2, %v5346_v42  ;;  %v5404_v53 = vsel %vm966_vm3, %v1022_v60, %v1023_v17  ;;  %v1033_v60 = vrot.slane %v5225_v51, 2  ;;  %v1043_v26 = vrot.slane %v5295_v36, 2 }
  0xa1   : > { %v5423_v10 = vsel %vm966_vm3, %v1027_v54, %v1028_v48  ;;  %v5436_v21 = vsel %vm966_vm3, %v1028_v48, %v1030_v44  ;;  %v1037_v54 = vrot.slane %v5257_v32, 2  ;;  %v1040_v48 = vrot.slane %v5289_v56, 2 }
  0xa3   : > { %3794 = vmatmul.mubr.msk.f32.gmra.mrb[30].mxu1 %vm378_vm2, %v5359_v43  ;;  %4020 = vmatmul.mubr.msk.f32.gmra.mrb[14].mxu0 %vm378_vm2, %v5362_v18  ;;  %v1038_v43 = vrot.slane %v5260_v59, 2 }
  0xa4   : > { %3798 = vmatprep.mubr.msk.f32.mxu1 %vm378_vm2, %v4869_v2  ;;  %4022 = vmatprep.mubr.msk.f32.mxu0 %vm378_vm2, %v5366_v25 }
  0xa5   : > { %v5457_v44 = vsel %vm966_vm3, %v1037_v54, %v1038_v43  ;;  %v5476_v56 = vsel %vm966_vm3, %v1038_v43, %v1040_v48  ;;  %v1913_v54 = vrot.slane %v5462_v45, 2 }
  0xa6   : > { %6200 = vst [vmem:[#allocation54_spill] sm:$0xff] %v5457_v44  ;;  %6201 = vst [vmem:[#allocation55_spill] sm:$0xff] %v5476_v56 }
  0xa7   : > { %3799 = vmatmul.mubr.msk.f32.vlgmr.msra.gmra.mrb[0].mxu1 %vm378_vm2, %v4875_v3  ;;  %4023 = vmatmul.mubr.msk.f32.gmra.mrb[16].mxu0 %vm378_vm2, %v5379_v37 }
  0xa8   : > { %3847 = vmatpush3.msk.msra.mxu1 %vm443_vm0, %v5030_v61  ;;  %3801 = vmatprep.mubr.msk.f32.mxu1 %vm378_vm2, %v4879_v6  ;;  %v5419_v61 = vsel %vm966_vm3, %v1023_v17, %v1025_v14  ;;  %v1035_v17 = vrot.slane %v5250_v62, 2  ;;  %v5440_v14 = vsel %vm966_vm3, %v1032_v52, %v1033_v60  ;;  %v1042_v52 = vrot.slane %v5292_v16, 2 }
  0xa9   : > { %4025 = vmatprep.mubr.msk.f32.mxu0 %vm378_vm2, %v5385_v34  ;;  %3896 = vmatprep.subr.msk.mxu1 %vm443_vm0, %v5387_v39  ;;  %6198 = vst [vmem:[#allocation52_spill] sm:$0xff] %v5440_v14 }
  0xaa   : > { %v5453_v62 = vsel %vm966_vm3, %v1033_v60, %v1035_v17  ;;  %v1045_v60 = vrot.slane %v5324_v9, 2  ;;  %v5480_v17 = vsel %vm966_vm3, %v1042_v52, %v1043_v26  ;;  %v5521_v52 = vld [vmem:[#allocation5 + $0x20] sm:$0xf] }
  0xab   : > { %3802 = vmatmul.mubr.msk.f32.gmra.mrb[2].mxu1 %vm378_vm2, %v4886_v8  ;;  %4026 = vmatmul.mubr.msk.f32.gmra.mrb[18].mxu0 %vm378_vm2, %v5398_v22  ;;  %6199 = vst [vmem:[#allocation53_spill] sm:$0xff] %v5453_v62  ;;  %v5465_v8 = vld [vmem:[%s4856_s26 + $0x188] sm:$0xff]  ;;  %6202 = vst [vmem:[#allocation56_spill] sm:$0xff] %v5480_v17 }
  0xac   : > { %3804 = vmatprep.mubr.msk.f32.mxu1 %vm378_vm2, %v4890_v11  ;;  %4028 = vmatprep.mubr.msk.f32.mxu0 %vm378_vm2, %v5404_v53  ;;  %v1914_v6 = vrot.slane %v5465_v8, 2  ;;  %v5496_v9 = vsel %vm966_vm3, %v1043_v26, %v1045_v60  ;;  %v970_v60 = vrot.slane %v4896_v13, 2  ;;  %v6207_v13 = vld [vmem:[#allocation32_spill] sm:$0xff] }
  0xad   : > { %6203 = vst [vmem:[#allocation57_spill] sm:$0xff] %v5496_v9 }
  0xae   : > { %v5500_v48 = vsel %vm966_vm3, %v1913_v54, %v1914_v6 }
  0xaf   : > { %3805 = vmatmul.mubr.msk.f32.gmra.mrb[4].mxu1 %vm378_vm2, %v4902_v15  ;;  %4029 = vmatmul.mubr.msk.f32.gmra.mrb[20].mxu0 %vm378_vm2, %v5419_v61  ;;  %6204 = vst [vmem:[#allocation58_spill] sm:$0xff] %v5500_v48 }
  0xb0   : > { %3807 = vmatprep.mubr.msk.f32.mxu1 %vm378_vm2, %v4911_v20  ;;  %4031 = vmatprep.mubr.msk.f32.mxu0 %vm378_vm2, %v5423_v10 }
  0xb3   : > { %3808 = vmatmul.mubr.msk.f32.gmra.mrb[6].mxu1 %vm378_vm2, %v4918_v24  ;;  %4032 = vmatmul.mubr.msk.f32.gmra.mrb[22].mxu0 %vm378_vm2, %v5436_v21 }
  0xb4   : > { %3810 = vmatprep.mubr.msk.f32.mxu1 %vm378_vm2, %v4929_v30  ;;  %4034 = vmatprep.mubr.msk.f32.mxu0 %vm378_vm2, %v5440_v14  ;;  %v5485_v14 = vld [vmem:[%s4856_s26 + $0x190] sm:$0x3] }
  0xb5   : > { %v1916_v43 = vrot.slane %v5485_v14, 2 }
  0xb7   : > { %3811 = vmatmul.mubr.msk.f32.gmra.mrb[8].mxu1 %vm378_vm2, %v4932_v31  ;;  %4035 = vmatmul.mubr.msk.f32.gmra.mrb[24].mxu0 %vm378_vm2, %v5453_v62  ;;  %v5511_v26 = vsel %vm966_vm3, %v1914_v6, %v1916_v43  ;;  %v967_v6 = vrot.slane %v4869_v2, 2  ;;  %v6211_v43 = vld [vmem:[#allocation40_spill] sm:$0xff] }
  0xb8   : > { %3813 = vmatprep.mubr.msk.f32.mxu1 %vm378_vm2, %v4958_v40  ;;  %4037 = vmatprep.mubr.msk.f32.mxu0 %vm378_vm2, %v5457_v44  ;;  %6205 = vst [vmem:[#allocation59_spill] sm:$0xff] %v5511_v26 }
  0xbb   : > { %3814 = vmatmul.mubr.msk.f32.gmra.mrb[10].mxu1 %vm378_vm2, %v4961_v41  ;;  %4038 = vmatmul.mubr.msk.f32.gmra.mrb[26].mxu0 %vm378_vm2, %v5476_v56 }
  0xbc   : > { %3816 = vmatprep.mubr.msk.f32.mxu1 %vm378_vm2, %v4987_v49  ;;  %4040 = vmatprep.mubr.msk.f32.mxu0 %vm378_vm2, %v5480_v17 }
  0xbf   : > { %3817 = vmatmul.mubr.msk.f32.gmra.mrb[12].mxu1 %vm378_vm2, %v4990_v50  ;;  %4041 = vmatmul.mubr.msk.f32.gmra.mrb[28].mxu0 %vm378_vm2, %v5496_v9 }
  0xc0   : > { %3819 = vmatprep.mubr.msk.f32.mxu1 %vm378_vm2, %v5013_v57  ;;  %4043 = vmatprep.mubr.msk.f32.mxu0 %vm378_vm2, %v5500_v48  ;;  %v6216_v48 = vld [vmem:[#allocation14_spill] sm:$0xff] }
  0xc3   : > { %3820 = vmatmul.mubr.msk.f32.gmra.mrb[14].mxu1 %vm378_vm2, %v5016_v58  ;;  %4044 = vmatmul.mubr.msk.f32.gmra.mrb[30].mxu0 %vm378_vm2, %v5511_v26  ;;  %v6215_v26 = vld [vmem:[#allocation13_spill] sm:$0xff] }
  0xc4   : > { %3822 = vmatprep.mubr.msk.f32.mxu1 %vm378_vm2, %v5043_v5  ;;  %4048 = vmatprep.mubr.msk.f32.mxu0 %vm378_vm2, %v4890_v11 }
  0xc7   : > { %3823 = vmatmul.mubr.msk.f32.gmra.mrb[16].mxu1 %vm378_vm2, %v5046_v7  ;;  %4049 = vmatmul.mubr.msk.f32.vlgmr.msra.gmra.mrb[0].mxu0 %vm378_vm2, %v4902_v15 }
  0xc8   : > { %4097 = vmatpush3.msk.msra.mxu0 %vm443_vm0, %v5151_v23  ;;  %3825 = vmatprep.mubr.msk.f32.mxu1 %vm378_vm2, %v5086_v28  ;;  %v968_v23 = vrot.slane %v4875_v3, 2  ;;  %v6206_v3 = vld [vmem:[#allocation30_spill] sm:$0xff] }
  0xc9   : > { %4051 = vmatprep.mubr.msk.f32.mxu0 %vm378_vm2, %v4911_v20  ;;  %4146 = vmatprep.subr.msk.mxu0 %vm443_vm0, %v5521_v52 }
  0xca   : > { %v969_v54 = vsel %vm966_vm3, %v967_v6, %v968_v23  ;;  %v971_v2 = vsel %vm966_vm3, %v968_v23, %v970_v60  ;;  %v6212_v6 = vld [vmem:[#allocation42_spill] sm:$0xff]  ;;  %v6213_v60 = vld [vmem:[#allocation45_spill] sm:$0xff] }
  0xcb   : > { %3826 = vmatmul.mubr.msk.f32.gmra.mrb[18].mxu1 %vm378_vm2, %v5089_v29  ;;  %4052 = vmatmul.mubr.msk.f32.gmra.mrb[2].mxu0 %vm378_vm2, %v4918_v24  ;;  %v5647_v23 = vld [vmem:[%s4856_s26 + $0x198] sm:$0xff] }
  0xcc   : > { %3828 = vmatprep.mubr.msk.f32.mxu1 %vm378_vm2, %v5112_v46  ;;  %4054 = vmatprep.mubr.msk.f32.mxu0 %vm378_vm2, %v4929_v30 }
  0xcf   : > { %3829 = vmatmul.mubr.msk.f32.gmra.mrb[20].mxu1 %vm378_vm2, %v5115_v47  ;;  %4055 = vmatmul.mubr.msk.f32.gmra.mrb[4].mxu0 %vm378_vm2, %v4932_v31 }
  0xd0   : > { %3831 = vmatprep.mubr.msk.f32.mxu1 %vm378_vm2, %v5146_v27  ;;  %4057 = vmatprep.mubr.msk.f32.mxu0 %vm378_vm2, %v4958_v40 }
  0xd3   : > { %3832 = vmatmul.mubr.msk.f32.gmra.mrb[22].mxu1 %vm378_vm2, %v5149_v33  ;;  %4058 = vmatmul.mubr.msk.f32.gmra.mrb[6].mxu0 %vm378_vm2, %v4961_v41 }
  0xd4   : > { %3834 = vmatprep.mubr.msk.f32.mxu1 %vm378_vm2, %v5185_v63  ;;  %4060 = vmatprep.mubr.msk.f32.mxu0 %vm378_vm2, %v4987_v49 }
  0xd7   : > { %3835 = vmatmul.mubr.msk.f32.gmra.mrb[24].mxu1 %vm378_vm2, %v5188_v0  ;;  %4061 = vmatmul.mubr.msk.f32.gmra.mrb[8].mxu0 %vm378_vm2, %v4990_v50 }
  0xd8   : > { %3837 = vmatprep.mubr.msk.f32.mxu1 %vm378_vm2, %v5222_v12  ;;  %4063 = vmatprep.mubr.msk.f32.mxu0 %vm378_vm2, %v5013_v57 }
  0xdb   : > { %3838 = vmatmul.mubr.msk.f32.gmra.mrb[26].mxu1 %vm378_vm2, %v5225_v51  ;;  %4064 = vmatmul.mubr.msk.f32.gmra.mrb[10].mxu0 %vm378_vm2, %v5016_v58 }
  0xdc   : > { %3840 = vmatprep.mubr.msk.f32.mxu1 %vm378_vm2, %v5257_v32  ;;  %4066 = vmatprep.mubr.msk.f32.mxu0 %vm378_vm2, %v5043_v5 }
  0xdf   : > { %3841 = vmatmul.mubr.msk.f32.gmra.mrb[28].mxu1 %vm378_vm2, %v5260_v59  ;;  %4067 = vmatmul.mubr.msk.f32.gmra.mrb[12].mxu0 %vm378_vm2, %v5046_v7 }
  0xe0   : > { %3843 = vmatprep.mubr.msk.f32.mxu1 %vm378_vm2, %v5292_v16  ;;  %4069 = vmatprep.mubr.msk.f32.mxu0 %vm378_vm2, %v5086_v28 }
  0xe3   : > { %3844 = vmatmul.mubr.msk.f32.gmra.mrb[30].mxu1 %vm378_vm2, %v5295_v36  ;;  %4070 = vmatmul.mubr.msk.f32.gmra.mrb[14].mxu0 %vm378_vm2, %v5089_v29 }
  0xe4   : > { %3848 = vmatprep.mubr.msk.f32.mxu1 %vm378_vm2, %v969_v54  ;;  %4072 = vmatprep.mubr.msk.f32.mxu0 %vm378_vm2, %v5112_v46  ;;  %v6214_v54 = vld [vmem:[#allocation47_spill] sm:$0xff] }
  0xe7   : > { %3849 = vmatmul.mubr.msk.f32.vlgmr.msra.gmra.mrb[0].mxu1 %vm378_vm2, %v971_v2  ;;  %4073 = vmatmul.mubr.msk.f32.gmra.mrb[16].mxu0 %vm378_vm2, %v5115_v47  ;;  %v5658_v2 = vld [vmem:[%s4856_s26 + $0x1a0] sm:$0xff] }
  0xe8   : > { %3897 = vmatpush3.msk.msra.mxu1 %vm443_vm0, %v5387_v39  ;;  %3851 = vmatprep.mubr.msk.f32.mxu1 %vm378_vm2, %v5107_v38  ;;  %v6208_v38 = vld [vmem:[#allocation34_spill] sm:$0xff] }
  0xe9   : > { %4075 = vmatprep.mubr.msk.f32.mxu0 %vm378_vm2, %v5146_v27  ;;  %4196 = vmatprep.subr.msk.mxu1 %vm443_vm0, %v4866_v1  ;;  %v6210_v39 = vld [vmem:[#allocation38_spill] sm:$0xff] }
  0xeb   : > { %3852 = vmatmul.mubr.msk.f32.gmra.mrb[2].mxu1 %vm378_vm2, %v5124_v55  ;;  %4076 = vmatmul.mubr.msk.f32.gmra.mrb[18].mxu0 %vm378_vm2, %v5149_v33  ;;  %v6209_v55 = vld [vmem:[#allocation36_spill] sm:$0xff] }
  0xec   : > { %3854 = vmatprep.mubr.msk.f32.mxu1 %vm378_vm2, %v5143_v19  ;;  %4078 = vmatprep.mubr.msk.f32.mxu0 %vm378_vm2, %v5185_v63 }
  0xef   : > { %3855 = vmatmul.mubr.msk.f32.gmra.mrb[4].mxu1 %vm378_vm2, %v5167_v35  ;;  %4079 = vmatmul.mubr.msk.f32.gmra.mrb[20].mxu0 %vm378_vm2, %v5188_v0 }
  0xf0   : > { %3857 = vmatprep.mubr.msk.f32.mxu1 %vm378_vm2, %v6206_v3  ;;  %4081 = vmatprep.mubr.msk.f32.mxu0 %vm378_vm2, %v5222_v12 }
  0xf3   : > { %3858 = vmatmul.mubr.msk.f32.gmra.mrb[6].mxu1 %vm378_vm2, %v6207_v13  ;;  %4082 = vmatmul.mubr.msk.f32.gmra.mrb[22].mxu0 %vm378_vm2, %v5225_v51 }
  0xf4   : > { %3860 = vmatprep.mubr.msk.f32.mxu1 %vm378_vm2, %v6208_v38  ;;  %4084 = vmatprep.mubr.msk.f32.mxu0 %vm378_vm2, %v5257_v32 }
  0xf7   : > { %3861 = vmatmul.mubr.msk.f32.gmra.mrb[8].mxu1 %vm378_vm2, %v6209_v55  ;;  %4085 = vmatmul.mubr.msk.f32.gmra.mrb[24].mxu0 %vm378_vm2, %v5260_v59 }
  0xf8   : > { %3863 = vmatprep.mubr.msk.f32.mxu1 %vm378_vm2, %v6210_v39  ;;  %4087 = vmatprep.mubr.msk.f32.mxu0 %vm378_vm2, %v5292_v16 }
  0xfb   : > { %3864 = vmatmul.mubr.msk.f32.gmra.mrb[10].mxu1 %vm378_vm2, %v6211_v43  ;;  %4088 = vmatmul.mubr.msk.f32.gmra.mrb[26].mxu0 %vm378_vm2, %v5295_v36  ;;  %v6217_v36 = vld [vmem:[#allocation15_spill] sm:$0xff] }
  0xfc   : > { %3866 = vmatprep.mubr.msk.f32.mxu1 %vm378_vm2, %v6212_v6  ;;  %4090 = vmatprep.mubr.msk.f32.mxu0 %vm378_vm2, %v5462_v45 }
  0xff   : > { %3867 = vmatmul.mubr.msk.f32.gmra.mrb[12].mxu1 %vm378_vm2, %v6213_v60  ;;  %4091 = vmatmul.mubr.msk.f32.gmra.mrb[28].mxu0 %vm378_vm2, %v5465_v8 }
 0x100   : > { %3869 = vmatprep.mubr.msk.f32.mxu1 %vm378_vm2, %v6214_v54  ;;  %4093 = vmatprep.mubr.msk.f32.mxu0 %vm378_vm2, %v5647_v23 }
 0x103   : > { %3870 = vmatmul.mubr.msk.f32.gmra.mrb[14].mxu1 %vm378_vm2, %v5338_v4  ;;  %4094 = vmatmul.mubr.msk.f32.gmra.mrb[30].mxu0 %vm378_vm2, %v5658_v2 }
 0x104   : > { %3872 = vmatprep.mubr.msk.f32.mxu1 %vm378_vm2, %v5346_v42  ;;  %4098 = vmatprep.mubr.msk.f32.mxu0 %vm378_vm2, %v6215_v26  ;;  %v6218_v42 = vld [vmem:[#allocation16_spill] sm:$0xff]  ;;  %v6219_v26 = vld [vmem:[#allocation17_spill] sm:$0xff] }
 0x107   : > { %3873 = vmatmul.mubr.msk.f32.gmra.mrb[16].mxu1 %vm378_vm2, %v5362_v18  ;;  %4099 = vmatmul.mubr.msk.f32.vlgmr.msra.gmra.mrb[0].mxu0 %vm378_vm2, %v6216_v48  ;;  %v6220_v48 = vld [vmem:[#allocation18_spill] sm:$0xff] }
 0x108   : > { %4147 = vmatpush3.msk.msra.mxu0 %vm443_vm0, %v5521_v52  ;;  %3875 = vmatprep.mubr.msk.f32.mxu1 %vm378_vm2, %v5366_v25  ;;  %v6223_v52 = vld [vmem:[#allocation21_spill] sm:$0xff] }
 0x109   : > { %4101 = vmatprep.mubr.msk.f32.mxu0 %vm378_vm2, %v6217_v36  ;;  %v6221_v36 = vld [vmem:[#allocation19_spill] sm:$0xff] }
 0x10b   : > { %3876 = vmatmul.mubr.msk.f32.gmra.mrb[18].mxu1 %vm378_vm2, %v5379_v37  ;;  %4102 = vmatmul.mubr.msk.f32.gmra.mrb[2].mxu0 %vm378_vm2, %v6218_v42  ;;  %v6222_v42 = vld [vmem:[#allocation20_spill] sm:$0xff] }
 0x10c   : > { %3878 = vmatprep.mubr.msk.f32.mxu1 %vm378_vm2, %v5385_v34  ;;  %4104 = vmatprep.mubr.msk.f32.mxu0 %vm378_vm2, %v6219_v26  ;;  %v6224_v26 = vld [vmem:[#allocation22_spill] sm:$0xff] }
 0x10f   : > { %3879 = vmatmul.mubr.msk.f32.gmra.mrb[20].mxu1 %vm378_vm2, %v5398_v22  ;;  %4105 = vmatmul.mubr.msk.f32.gmra.mrb[4].mxu0 %vm378_vm2, %v6220_v48  ;;  %v6225_v48 = vld [vmem:[#allocation52_spill] sm:$0xff] }
 0x110   : > { %3881 = vmatprep.mubr.msk.f32.mxu1 %vm378_vm2, %v5404_v53  ;;  %4107 = vmatprep.mubr.msk.f32.mxu0 %vm378_vm2, %v6221_v36  ;;  %v6226_v36 = vld [vmem:[#allocation23_spill] sm:$0xff] }
 0x113   : > { %3882 = vmatmul.mubr.msk.f32.gmra.mrb[22].mxu1 %vm378_vm2, %v5419_v61  ;;  %4108 = vmatmul.mubr.msk.f32.gmra.mrb[6].mxu0 %vm378_vm2, %v6222_v42  ;;  %v6227_v42 = vld [vmem:[#allocation24_spill] sm:$0xff] }
 0x114   : > { %3884 = vmatprep.mubr.msk.f32.mxu1 %vm378_vm2, %v5423_v10  ;;  %4110 = vmatprep.mubr.msk.f32.mxu0 %vm378_vm2, %v6223_v52  ;;  %v6228_v52 = vld [vmem:[#allocation25_spill] sm:$0xff] }
 0x117   : > { %3885 = vmatmul.mubr.msk.f32.gmra.mrb[24].mxu1 %vm378_vm2, %v5436_v21  ;;  %4111 = vmatmul.mubr.msk.f32.gmra.mrb[8].mxu0 %vm378_vm2, %v6224_v26  ;;  %v6229_v26 = vld [vmem:[#allocation26_spill] sm:$0xff] }
 0x118   : > { %3887 = vmatprep.mubr.msk.f32.mxu1 %vm378_vm2, %v6225_v48  ;;  %4113 = vmatprep.mubr.msk.f32.mxu0 %vm378_vm2, %v6226_v36  ;;  %v6230_v36 = vld [vmem:[#allocation27_spill] sm:$0xff] }
 0x11b   : > { %3888 = vmatmul.mubr.msk.f32.gmra.mrb[26].mxu1 %vm378_vm2, %v5453_v62  ;;  %4114 = vmatmul.mubr.msk.f32.gmra.mrb[10].mxu0 %vm378_vm2, %v6227_v42  ;;  %v6231_v42 = vld [vmem:[#allocation28_spill] sm:$0xff]  ;;  %v5785_v62 = vld [vmem:[%s4856_s26 + $0x1a8] sm:$0x3] }
 0x11c   : > { %3890 = vmatprep.mubr.msk.f32.mxu1 %vm378_vm2, %v5457_v44  ;;  %4116 = vmatprep.mubr.msk.f32.mxu0 %vm378_vm2, %v6228_v52  ;;  %v6232_v44 = vld [vmem:[#allocation11_spill] sm:$0xff]  ;;  %v6233_v52 = vld [vmem:[#allocation29_spill] sm:$0xff] }
 0x11f   : > { %3891 = vmatmul.mubr.msk.f32.gmra.mrb[28].mxu1 %vm378_vm2, %v5476_v56  ;;  %4117 = vmatmul.mubr.msk.f32.gmra.mrb[12].mxu0 %vm378_vm2, %v6229_v26  ;;  %v6234_v56 = vld [vmem:[#allocation12_spill] sm:$0xff]  ;;  %v6235_v26 = vld [vmem:[#allocation31_spill] sm:$0xff] }
 0x120   : > { %3893 = vmatprep.mubr.msk.f32.mxu1 %vm378_vm2, %v5480_v17  ;;  %4119 = vmatprep.mubr.msk.f32.mxu0 %vm378_vm2, %v6230_v36  ;;  %v6243_v17 = vld [vmem:[#allocation48_spill] sm:$0xff] }
 0x123   : > { %3894 = vmatmul.mubr.msk.f32.gmra.mrb[30].mxu1 %vm378_vm2, %v5496_v9  ;;  %4120 = vmatmul.mubr.msk.f32.gmra.mrb[14].mxu0 %vm378_vm2, %v6231_v42  ;;  %v6236_v9 = vld [vmem:[#allocation33_spill] sm:$0xff] }
 0x124   : > { %3898 = vmatprep.mubr.msk.f32.mxu1 %vm378_vm2, %v6232_v44  ;;  %4122 = vmatprep.mubr.msk.f32.mxu0 %vm378_vm2, %v6233_v52  ;;  %v6237_v44 = vld [vmem:[#allocation35_spill] sm:$0xff] }
 0x127   : > { %3899 = vmatmul.mubr.msk.f32.vlgmr.msra.gmra.mrb[0].mxu1 %vm378_vm2, %v6234_v56  ;;  %4123 = vmatmul.mubr.msk.f32.gmra.mrb[16].mxu0 %vm378_vm2, %v6235_v26  ;;  %v6238_v56 = vld [vmem:[#allocation37_spill] sm:$0xff] }
 0x128   : > { %4197 = vmatpush3.msk.msra.mxu1 %vm443_vm0, %v4866_v1  ;;  %3901 = vmatprep.mubr.msk.f32.mxu1 %vm378_vm2, %v4890_v11  ;;  %v6239_v1 = vld [vmem:[#allocation39_spill] sm:$0xff]  ;;  %v6240_v11 = vld [vmem:[#allocation41_spill] sm:$0xff] }
 0x129   : > { %4125 = vmatprep.mubr.msk.f32.mxu0 %vm378_vm2, %v6236_v9 }
 0x12b   : > { %3902 = vmatmul.mubr.msk.f32.gmra.mrb[2].mxu1 %vm378_vm2, %v4902_v15  ;;  %4126 = vmatmul.mubr.msk.f32.gmra.mrb[18].mxu0 %vm378_vm2, %v6237_v44  ;;  %v6241_v15 = vld [vmem:[#allocation44_spill] sm:$0xff] }
 0x12c   : > { %3904 = vmatprep.mubr.msk.f32.mxu1 %vm378_vm2, %v4911_v20  ;;  %4128 = vmatprep.mubr.msk.f32.mxu0 %vm378_vm2, %v6238_v56  ;;  %v6242_v20 = vld [vmem:[#allocation46_spill] sm:$0xff] }
 0x12f   : > { %3905 = vmatmul.mubr.msk.f32.gmra.mrb[4].mxu1 %vm378_vm2, %v4918_v24  ;;  %4129 = vmatmul.mubr.msk.f32.gmra.mrb[20].mxu0 %vm378_vm2, %v6239_v1  ;;  %v1642_v24 = vrot.slane %v5462_v45, 1 }
 0x130   : > { %3907 = vmatprep.mubr.msk.f32.mxu1 %vm378_vm2, %v4929_v30  ;;  %4131 = vmatprep.mubr.msk.f32.mxu0 %vm378_vm2, %v6240_v11  ;;  %v1643_v30 = vrot.slane %v5465_v8, 1 }
 0x132   : > { %v5782_v11 = vsel %vm297_vm1, %v1642_v24, %v1643_v30 }
 0x133   : > { %3908 = vmatmul.mubr.msk.f32.gmra.mrb[6].mxu1 %vm378_vm2, %v4932_v31  ;;  %4132 = vmatmul.mubr.msk.f32.gmra.mrb[22].mxu0 %vm378_vm2, %v6241_v15  ;;  %v6244_v31 = vld [vmem:[#allocation49_spill] sm:$0xff]  ;;  %v2454_v15 = vrot.slane %v5658_v2, 1 }
 0x134   : > { %3910 = vmatprep.mubr.msk.f32.mxu1 %vm378_vm2, %v4958_v40  ;;  %4134 = vmatprep.mubr.msk.f32.mxu0 %vm378_vm2, %v6242_v20  ;;  %v1645_v40 = vrot.slane %v5485_v14, 1  ;;  %v2453_v20 = vrot.slane %v5647_v23, 1  ;;  %v2456_v14 = vrot.slane %v5785_v62, 1 }
 0x136   : > { %v2455_v24 = vsel %vm297_vm1, %v2453_v20, %v2454_v15 }
 0x137   : > { %3911 = vmatmul.mubr.msk.f32.gmra.mrb[8].mxu1 %vm378_vm2, %v4961_v41  ;;  %4135 = vmatmul.mubr.msk.f32.gmra.mrb[24].mxu0 %vm378_vm2, %v6243_v17  ;;  %v6245_v41 = vld [vmem:[#allocation51_spill] sm:$0xff] }
 0x138   : > { %3913 = vmatprep.mubr.msk.f32.mxu1 %vm378_vm2, %v4987_v49  ;;  %4137 = vmatprep.mubr.msk.f32.mxu0 %vm378_vm2, %v6244_v31  ;;  %v5796_v49 = vsel %vm297_vm1, %v1643_v30, %v1645_v40 }
 0x13b   : > { %3914 = vmatmul.mubr.msk.f32.gmra.mrb[10].mxu1 %vm378_vm2, %v4990_v50  ;;  %4138 = vmatmul.mubr.msk.f32.gmra.mrb[26].mxu0 %vm378_vm2, %v6245_v41  ;;  %v2457_v50 = vsel %vm297_vm1, %v2454_v15, %v2456_v14 }
 0x13c   : > { %3916 = vmatprep.mubr.msk.f32.mxu1 %vm378_vm2, %v5013_v57  ;;  %4140 = vmatprep.mubr.msk.f32.mxu0 %vm378_vm2, %v5782_v11  ;;  %v6246_v57 = vld [vmem:[#allocation50_spill] sm:$0xff] }
 0x13f   : > { %3917 = vmatmul.mubr.msk.f32.gmra.mrb[12].mxu1 %vm378_vm2, %v5016_v58  ;;  %4141 = vmatmul.mubr.msk.f32.gmra.mrb[28].mxu0 %vm378_vm2, %v5796_v49  ;;  %v6250_v58 = vld [vmem:[#allocation54_spill] sm:$0xff] }
 0x140   : > { %3919 = vmatprep.mubr.msk.f32.mxu1 %vm378_vm2, %v5043_v5  ;;  %4143 = vmatprep.mubr.msk.f32.mxu0 %vm378_vm2, %v2455_v24  ;;  %v6251_v5 = vld [vmem:[#allocation44_spill] sm:$0xff] }
 0x143   : > { %3920 = vmatmul.mubr.msk.f32.gmra.mrb[14].mxu1 %vm378_vm2, %v5046_v7  ;;  %4144 = vmatmul.mubr.msk.f32.gmra.mrb[30].mxu0 %vm378_vm2, %v2457_v50  ;;  %v6252_v7 = vld [vmem:[#allocation55_spill] sm:$0xff] }
 0x144   : > { %3922 = vmatprep.mubr.msk.f32.mxu1 %vm378_vm2, %v5086_v28  ;;  %4148 = vmatprep.mubr.msk.f32.mxu0 %vm378_vm2, %v5143_v19  ;;  %v6254_v28 = vld [vmem:[#allocation56_spill] sm:$0xff]  ;;  %v2727_v19 = vrot.slane %v5785_v62, 2 }
 0x147   : > { %3923 = vmatmul.mubr.msk.f32.gmra.mrb[16].mxu1 %vm378_vm2, %v5089_v29  ;;  %4149 = vmatmul.mubr.msk.f32.vlgmr.msra.gmra.mrb[0].mxu0 %vm378_vm2, %v5167_v35  ;;  %v2724_v29 = vrot.slane %v5647_v23, 2  ;;  %v2725_v35 = vrot.slane %v5658_v2, 2 }
 0x148   : > { %3925 = vmatprep.mubr.msk.f32.mxu1 %vm378_vm2, %v5112_v46  ;;  %4151 = vmatprep.mubr.msk.f32.mxu0 %vm378_vm2, %v6206_v3  ;;  %v6255_v46 = vld [vmem:[#allocation57_spill] sm:$0xff] }
 0x14b   : > { %3926 = vmatmul.mubr.msk.f32.gmra.mrb[18].mxu1 %vm378_vm2, %v5115_v47  ;;  %4152 = vmatmul.mubr.msk.f32.gmra.mrb[2].mxu0 %vm378_vm2, %v6207_v13  ;;  %v6256_v47 = vld [vmem:[#allocation58_spill] sm:$0xff] }
 0x14c   : > { %3928 = vmatprep.mubr.msk.f32.mxu1 %vm378_vm2, %v5146_v27  ;;  %4154 = vmatprep.mubr.msk.f32.mxu0 %vm378_vm2, %v6208_v38  ;;  %v2726_v27 = vsel %vm966_vm3, %v2724_v29, %v2725_v35 }
 0x14f   : > { %3929 = vmatmul.mubr.msk.f32.gmra.mrb[20].mxu1 %vm378_vm2, %v5149_v33  ;;  %4155 = vmatmul.mubr.msk.f32.gmra.mrb[4].mxu0 %vm378_vm2, %v6209_v55  ;;  %v6257_v33 = vld [vmem:[#allocation59_spill] sm:$0xff] }
 0x150   : > { %3931 = vmatprep.mubr.msk.f32.mxu1 %vm378_vm2, %v5185_v63  ;;  %4157 = vmatprep.mubr.msk.f32.mxu0 %vm378_vm2, %v6210_v39  ;;  %v2728_v63 = vsel %vm966_vm3, %v2725_v35, %v2727_v19 }
 0x153   : > { %3932 = vmatmul.mubr.msk.f32.gmra.mrb[22].mxu1 %vm378_vm2, %v5188_v0  ;;  %4158 = vmatmul.mubr.msk.f32.gmra.mrb[6].mxu0 %vm378_vm2, %v6211_v43 }
 0x154   : > { %3934 = vmatprep.mubr.msk.f32.mxu1 %vm378_vm2, %v5222_v12  ;;  %4160 = vmatprep.mubr.msk.f32.mxu0 %vm378_vm2, %v6212_v6  ;;  %v6253_v12 = vld [vmem:[#allocation46_spill] sm:$0xff] }
 0x157   : > { %3935 = vmatmul.mubr.msk.f32.gmra.mrb[24].mxu1 %vm378_vm2, %v5225_v51  ;;  %4161 = vmatmul.mubr.msk.f32.gmra.mrb[8].mxu0 %vm378_vm2, %v6213_v60  ;;  %v6247_v51 = vld [vmem:[#allocation43_spill] sm:$0xff] }
 0x158   : > { %3937 = vmatprep.mubr.msk.f32.mxu1 %vm378_vm2, %v5257_v32  ;;  %4163 = vmatprep.mubr.msk.f32.mxu0 %vm378_vm2, %v6214_v54  ;;  %v6249_v32 = vld [vmem:[#allocation41_spill] sm:$0xff] }
 0x15b   : > { %3938 = vmatmul.mubr.msk.f32.gmra.mrb[26].mxu1 %vm378_vm2, %v5260_v59  ;;  %4164 = vmatmul.mubr.msk.f32.gmra.mrb[10].mxu0 %vm378_vm2, %v5338_v4 }
 0x15c   : > { %3940 = vmatprep.mubr.msk.f32.mxu1 %vm378_vm2, %v5292_v16  ;;  %4166 = vmatprep.mubr.msk.f32.mxu0 %vm378_vm2, %v6246_v57 }
 0x15f   : > { %3941 = vmatmul.mubr.msk.f32.gmra.mrb[28].mxu1 %vm378_vm2, %v6247_v51  ;;  %4167 = vmatmul.mubr.msk.f32.gmra.mrb[12].mxu0 %vm378_vm2, %v5362_v18 }
 0x160   : > { %3943 = vmatprep.mubr.msk.f32.mxu1 %vm378_vm2, %v5462_v45  ;;  %4169 = vmatprep.mubr.msk.f32.mxu0 %vm378_vm2, %v5366_v25 }
 0x163   : > { %3944 = vmatmul.mubr.msk.f32.gmra.mrb[30].mxu1 %vm378_vm2, %v5465_v8  ;;  %4170 = vmatmul.mubr.msk.f32.gmra.mrb[14].mxu0 %vm378_vm2, %v5379_v37  ;;  %v6248_v8 = vld [vmem:[#allocation53_spill] sm:$0xff] }
 0x164   : > { %3972 = vmatprep.mubr.msk.f32.mxu1 %vm378_vm2, %v6230_v36  ;;  %4172 = vmatprep.mubr.msk.f32.mxu0 %vm378_vm2, %v5385_v34 }
 0x167   : > { %3973 = vmatmul.mubr.msk.f32.vlgmr.msra.gmra.mrb[16].mxu1 %vm378_vm2, %v6231_v42  ;;  %4173 = vmatmul.mubr.msk.f32.gmra.mrb[16].mxu0 %vm378_vm2, %v5398_v22 }
 0x168   : > { %3975 = vmatprep.mubr.msk.f32.mxu1 %vm378_vm2, %v6233_v52  ;;  %4175 = vmatprep.mubr.msk.f32.mxu0 %vm378_vm2, %v5404_v53 }
 0x16b   : > { %3976 = vmatmul.mubr.msk.f32.gmra.mrb[18].mxu1 %vm378_vm2, %v6235_v26  ;;  %4176 = vmatmul.mubr.msk.f32.gmra.mrb[18].mxu0 %vm378_vm2, %v5419_v61 }
 0x16c   : > { %3978 = vmatprep.mubr.msk.f32.mxu1 %vm378_vm2, %v6236_v9  ;;  %4178 = vmatprep.mubr.msk.f32.mxu0 %vm378_vm2, %v5423_v10 }
 0x16f   : > { %3979 = vmatmul.mubr.msk.f32.gmra.mrb[20].mxu1 %vm378_vm2, %v6237_v44  ;;  %4179 = vmatmul.mubr.msk.f32.gmra.mrb[20].mxu0 %vm378_vm2, %v5436_v21 }
 0x170   : > { %3981 = vmatprep.mubr.msk.f32.mxu1 %vm378_vm2, %v6238_v56  ;;  %4181 = vmatprep.mubr.msk.f32.mxu0 %vm378_vm2, %v6225_v48 }
 0x173   : > { %3982 = vmatmul.mubr.msk.f32.gmra.mrb[22].mxu1 %vm378_vm2, %v6239_v1  ;;  %4182 = vmatmul.mubr.msk.f32.gmra.mrb[22].mxu0 %vm378_vm2, %v6248_v8 }
 0x174   : > { %3984 = vmatprep.mubr.msk.f32.mxu1 %vm378_vm2, %v6249_v32  ;;  %4184 = vmatprep.mubr.msk.f32.mxu0 %vm378_vm2, %v6250_v58 }
 0x177   : > { %3985 = vmatmul.mubr.msk.f32.gmra.mrb[24].mxu1 %vm378_vm2, %v6251_v5  ;;  %4185 = vmatmul.mubr.msk.f32.gmra.mrb[24].mxu0 %vm378_vm2, %v6252_v7 }
 0x178   : > { %3987 = vmatprep.mubr.msk.f32.mxu1 %vm378_vm2, %v6253_v12  ;;  %4187 = vmatprep.mubr.msk.f32.mxu0 %vm378_vm2, %v6254_v28 }
 0x17b   : > { %3988 = vmatmul.mubr.msk.f32.gmra.mrb[26].mxu1 %vm378_vm2, %v6243_v17  ;;  %4188 = vmatmul.mubr.msk.f32.gmra.mrb[26].mxu0 %vm378_vm2, %v6255_v46 }
 0x17c   : > { %3990 = vmatprep.mubr.msk.f32.mxu1 %vm378_vm2, %v6244_v31  ;;  %4190 = vmatprep.mubr.msk.f32.mxu0 %vm378_vm2, %v6256_v47 }
 0x17f   : > { %3991 = vmatmul.mubr.msk.f32.gmra.mrb[28].mxu1 %vm378_vm2, %v6245_v41  ;;  %4191 = vmatmul.mubr.msk.f32.gmra.mrb[28].mxu0 %vm378_vm2, %v6257_v33 }
 0x180   : > { %3993 = vmatprep.mubr.msk.f32.mxu1 %vm378_vm2, %v5782_v11  ;;  %4193 = vmatprep.mubr.msk.f32.mxu0 %vm378_vm2, %v2726_v27 }
 0x183   : > { %3994 = vmatmul.mubr.msk.f32.gmra.mrb[30].mxu1 %vm378_vm2, %v5796_v49  ;;  %4194 = vmatmul.mubr.msk.f32.gmra.mrb[30].mxu0 %vm378_vm2, %v2728_v63 }
 0x1fa   : > { %v3900_v0 = vpop.f32.mrb[0].mxu1 }
 0x1fb   : > { %v1448_v16 = vpop.f32.mrb[1].mxu1 }
 0x1fe   : > { %v3903_v59 = vpop.f32.mrb[2].mxu1 }
 0x1ff   : > { %v1458_v45 = vpop.f32.mrb[3].mxu1 }
 0x202   : > { %v3906_v4 = vpop.f32.mrb[4].mxu1 }
 0x203   : > { %v1468_v18 = vpop.f32.mrb[5].mxu1 }
 0x206   : > { %v3909_v25 = vpop.f32.mrb[6].mxu1 }
 0x207   : > { %v1478_v37 = vpop.f32.mrb[7].mxu1 }
 0x20a   : > { %v3912_v34 = vpop.f32.mrb[8].mxu1 }
 0x20b   : > { %v1488_v22 = vpop.f32.mrb[9].mxu1 }
 0x20e   : > { %v3915_v53 = vpop.f32.mrb[10].mxu1 }
 0x20f   : > { %v1498_v61 = vpop.f32.mrb[11].mxu1 }
 0x212   : > { %v3918_v10 = vpop.f32.mrb[12].mxu1 }
 0x213   : > { %v1508_v21 = vpop.f32.mrb[13].mxu1 }
 0x216   : > { %v3921_v62 = vpop.f32.mrb[14].mxu1 }
 0x217   : > { %v1518_v17 = vpop.f32.mrb[15].mxu1 }
 0x21a   : > { %v4150_v9 = vpop.f32.mrb[0].mxu0 }
 0x21b   : > { %v4198_v3 = vadd.f32 %v4150_v9, %v3900_v0  ;;  %v2802_v13 = vpop.f32.mrb[1].mxu0 }
 0x21c   : > { %v4199_v38 = vadd.f32 %v2802_v13, %v1448_v16 }
 0x21d   : > { %2995 = vst.msk [vmem:[%s5943_s19 + $0x8] sm:$0xff] %vm2993_vm4, %v4198_v3 }
 0x21e   : > { %2994 = vst.msk [vmem:[%s5943_s19] sm:$0xff] %vm2993_vm4, %v4199_v38  ;;  %v4153_v55 = vpop.f32.mrb[2].mxu0 }
 0x21f   : > { %v4200_v39 = vadd.f32 %v4153_v55, %v3903_v59  ;;  %v2812_v43 = vpop.f32.mrb[3].mxu0 }
 0x220   : > { %v4201_v6 = vadd.f32 %v2812_v43, %v1458_v45 }
 0x221   : > { %2997 = vst.msk [vmem:[%s5943_s19 + $0x18] sm:$0xff] %vm2993_vm4, %v4200_v39 }
 0x222   : > { %2996 = vst.msk [vmem:[%s5943_s19 + $0x10] sm:$0xff] %vm2993_vm4, %v4201_v6  ;;  %v4156_v23 = vpop.f32.mrb[4].mxu0 }
 0x223   : > { %v4202_v60 = vadd.f32 %v4156_v23, %v3906_v4  ;;  %v2822_v54 = vpop.f32.mrb[5].mxu0 }
 0x224   : > { %v4203_v2 = vadd.f32 %v2822_v54, %v1468_v18 }
 0x225   : > { %2999 = vst.msk [vmem:[%s5943_s19 + $0x28] sm:$0xff] %vm2993_vm4, %v4202_v60 }
 0x226   : > { %2998 = vst.msk [vmem:[%s5943_s19 + $0x20] sm:$0xff] %vm2993_vm4, %v4203_v2  ;;  %v4159_v48 = vpop.f32.mrb[6].mxu0 }
 0x227   : > { %v4204_v36 = vadd.f32 %v4159_v48, %v3909_v25  ;;  %v2832_v42 = vpop.f32.mrb[7].mxu0 }
 0x228   : > { %v4205_v52 = vadd.f32 %v2832_v42, %v1478_v37 }
 0x229   : > { %3001 = vst.msk [vmem:[%s5943_s19 + $0x38] sm:$0xff] %vm2993_vm4, %v4204_v36 }
 0x22a   : > { %3000 = vst.msk [vmem:[%s5943_s19 + $0x30] sm:$0xff] %vm2993_vm4, %v4205_v52  ;;  %v4162_v26 = vpop.f32.mrb[8].mxu0 }
 0x22b   : > { %v4206_v44 = vadd.f32 %v4162_v26, %v3912_v34  ;;  %v2842_v56 = vpop.f32.mrb[9].mxu0 }
 0x22c   : > { %v4207_v1 = vadd.f32 %v2842_v56, %v1488_v22 }
 0x22d   : > { %3003 = vst.msk [vmem:[%s5943_s19 + $0x48] sm:$0xff] %vm2993_vm4, %v4206_v44 }
 0x22e   : > { %3002 = vst.msk [vmem:[%s5943_s19 + $0x40] sm:$0xff] %vm2993_vm4, %v4207_v1  ;;  %v4165_v11 = vpop.f32.mrb[10].mxu0 }
 0x22f   : > { %v4208_v15 = vadd.f32 %v4165_v11, %v3915_v53  ;;  %v2852_v20 = vpop.f32.mrb[11].mxu0 }
 0x230   : > { %v4209_v30 = vadd.f32 %v2852_v20, %v1498_v61 }
 0x231   : > { %3005 = vst.msk [vmem:[%s5943_s19 + $0x58] sm:$0xff] %vm2993_vm4, %v4208_v15 }
 0x232   : > { %3004 = vst.msk [vmem:[%s5943_s19 + $0x50] sm:$0xff] %vm2993_vm4, %v4209_v30  ;;  %v4168_v31 = vpop.f32.mrb[12].mxu0 }
 0x233   : > { %v4210_v40 = vadd.f32 %v4168_v31, %v3918_v10  ;;  %v2862_v41 = vpop.f32.mrb[13].mxu0 }
 0x234   : > { %v4211_v49 = vadd.f32 %v2862_v41, %v1508_v21 }
 0x235   : > { %3007 = vst.msk [vmem:[%s5943_s19 + $0x68] sm:$0xff] %vm2993_vm4, %v4210_v40 }
 0x236   : > { %3006 = vst.msk [vmem:[%s5943_s19 + $0x60] sm:$0xff] %vm2993_vm4, %v4211_v49  ;;  %v4171_v14 = vpop.f32.mrb[14].mxu0 }
 0x237   : > { %v4212_v24 = vadd.f32 %v4171_v14, %v3921_v62  ;;  %v2872_v50 = vpop.f32.mrb[15].mxu0 }
 0x238   : > { %v4213_v57 = vadd.f32 %v2872_v50, %v1518_v17 }
 0x239   : > { %3009 = vst.msk [vmem:[%s5943_s19 + $0x78] sm:$0xff] %vm2993_vm4, %v4212_v24 }
 0x23a   : > { %3008 = vst.msk [vmem:[%s5943_s19 + $0x70] sm:$0xff] %vm2993_vm4, %v4213_v57  ;;  %v3974_v51 = vpop.f32.mrb[16].mxu1  ;;  %v4174_v8 = vpop.f32.mrb[16].mxu0 }
 0x23b   : > { %v4214_v32 = vadd.f32 %v4174_v8, %v3974_v51  ;;  %v1800_v58 = vpop.f32.mrb[17].mxu1  ;;  %v2882_v5 = vpop.f32.mrb[17].mxu0 }
 0x23c   : > { %v4215_v7 = vadd.f32 %v2882_v5, %v1800_v58 }
 0x23d   : > { %3011 = vst.msk [vmem:[%s5943_s19 + $0x88] sm:$0xff] %vm2993_vm4, %v4214_v32 }
 0x23e   : > { %3010 = vst.msk [vmem:[%s5943_s19 + $0x80] sm:$0xff] %vm2993_vm4, %v4215_v7  ;;  %v3977_v12 = vpop.f32.mrb[18].mxu1  ;;  %v4177_v28 = vpop.f32.mrb[18].mxu0 }
 0x23f   : > { %v4216_v29 = vadd.f32 %v4177_v28, %v3977_v12  ;;  %v1810_v35 = vpop.f32.mrb[19].mxu1  ;;  %v2892_v46 = vpop.f32.mrb[19].mxu0 }
 0x240   : > { %v4217_v47 = vadd.f32 %v2892_v46, %v1810_v35 }
 0x241   : > { %3013 = vst.msk [vmem:[%s5943_s19 + $0x98] sm:$0xff] %vm2993_vm4, %v4216_v29 }
 0x242   : > { %3012 = vst.msk [vmem:[%s5943_s19 + $0x90] sm:$0xff] %vm2993_vm4, %v4217_v47  ;;  %v3980_v19 = vpop.f32.mrb[20].mxu1  ;;  %v4180_v27 = vpop.f32.mrb[20].mxu0 }
 0x243   : > { %v4218_v33 = vadd.f32 %v4180_v27, %v3980_v19  ;;  %v1820_v63 = vpop.f32.mrb[21].mxu1  ;;  %v2902_v0 = vpop.f32.mrb[21].mxu0 }
 0x244   : > { %v4219_v16 = vadd.f32 %v2902_v0, %v1820_v63 }
 0x245   : > { %3015 = vst.msk [vmem:[%s5943_s19 + $0xa8] sm:$0xff] %vm2993_vm4, %v4218_v33 }
 0x246   : > { %3014 = vst.msk [vmem:[%s5943_s19 + $0xa0] sm:$0xff] %vm2993_vm4, %v4219_v16  ;;  %v3983_v59 = vpop.f32.mrb[22].mxu1  ;;  %v4183_v45 = vpop.f32.mrb[22].mxu0 }
 0x247   : > { %v4220_v4 = vadd.f32 %v4183_v45, %v3983_v59  ;;  %v1830_v18 = vpop.f32.mrb[23].mxu1  ;;  %v2912_v25 = vpop.f32.mrb[23].mxu0 }
 0x248   : > { %v4221_v37 = vadd.f32 %v2912_v25, %v1830_v18 }
 0x249   : > { %3017 = vst.msk [vmem:[%s5943_s19 + $0xb8] sm:$0xff] %vm2993_vm4, %v4220_v4 }
 0x24a   : > { %3016 = vst.msk [vmem:[%s5943_s19 + $0xb0] sm:$0xff] %vm2993_vm4, %v4221_v37  ;;  %v3986_v34 = vpop.f32.mrb[24].mxu1  ;;  %v4186_v22 = vpop.f32.mrb[24].mxu0 }
 0x24b   : > { %v4222_v53 = vadd.f32 %v4186_v22, %v3986_v34  ;;  %v1840_v61 = vpop.f32.mrb[25].mxu1  ;;  %v2922_v10 = vpop.f32.mrb[25].mxu0 }
 0x24c   : > { %v4223_v21 = vadd.f32 %v2922_v10, %v1840_v61 }
 0x24d   : > { %3019 = vst.msk [vmem:[%s5943_s19 + $0xc8] sm:$0xff] %vm2993_vm4, %v4222_v53 }
 0x24e   : > { %3018 = vst.msk [vmem:[%s5943_s19 + $0xc0] sm:$0xff] %vm2993_vm4, %v4223_v21  ;;  %v3989_v62 = vpop.f32.mrb[26].mxu1  ;;  %v4189_v17 = vpop.f32.mrb[26].mxu0 }
 0x24f   : > { %v4224_v9 = vadd.f32 %v4189_v17, %v3989_v62  ;;  %v1850_v3 = vpop.f32.mrb[27].mxu1  ;;  %v2932_v13 = vpop.f32.mrb[27].mxu0 }
 0x250   : > { %v4225_v38 = vadd.f32 %v2932_v13, %v1850_v3 }
 0x251   : > { %3021 = vst.msk [vmem:[%s5943_s19 + $0xd8] sm:$0xff] %vm2993_vm4, %v4224_v9 }
 0x252   : > { %3020 = vst.msk [vmem:[%s5943_s19 + $0xd0] sm:$0xff] %vm2993_vm4, %v4225_v38  ;;  %v3992_v55 = vpop.f32.mrb[28].mxu1  ;;  %v4192_v39 = vpop.f32.mrb[28].mxu0 }
 0x253   : > { %v4226_v43 = vadd.f32 %v4192_v39, %v3992_v55  ;;  %v1860_v6 = vpop.f32.mrb[29].mxu1  ;;  %v2942_v23 = vpop.f32.mrb[29].mxu0 }
 0x254   : > { %v4227_v60 = vadd.f32 %v2942_v23, %v1860_v6 }
 0x255   : > { %3023 = vst.msk [vmem:[%s5943_s19 + $0xe8] sm:$0xff] %vm2993_vm4, %v4226_v43 }
 0x256   : > { %3022 = vst.msk [vmem:[%s5943_s19 + $0xe0] sm:$0xff] %vm2993_vm4, %v4227_v60  ;;  %v3995_v54 = vpop.f32.mrb[30].mxu1  ;;  %v4195_v2 = vpop.f32.mrb[30].mxu0 }
 0x257   : > { %v4228_v48 = vadd.f32 %v4195_v2, %v3995_v54  ;;  %v1870_v36 = vpop.f32.mrb[31].mxu1  ;;  %v2952_v42 = vpop.f32.mrb[31].mxu0 }
 0x258   : > { %v4229_v52 = vadd.f32 %v2952_v42, %v1870_v36 }
 0x259   : > { %3025 = vst.msk [vmem:[%s5943_s19 + $0xf8] sm:$0xff] %vm2993_vm4, %v4228_v48 }
 0x25a   : > { %3024 = vst.msk [vmem:[%s5943_s19 + $0xf0] sm:$0xff] %vm2993_vm4, %v4229_v52 }
 0x25b   : > { %4607 = shalt.err (!%p4604_p5)
}
 0x25c   : > { %s4608_s4 = scalar_lea.hbm %s6010_s6, 4096  ;;  %s4612_s15 = scalar_lea.hbm %s6067_s2, 8192 }
 0x25d   : > { %p4609_p9 = scmp.ne.s32.totalorder %s6010_s6, %s4608_s4  ;;  %p4613_p3 = scmp.lt.u32.totalorder %s6010_s6, %s6067_s2 }
 0x25e   : > { %p4614_p7 = scmp.lt.u32.totalorder %s4612_s15, %s4608_s4  ;;  %p4616_p4 = scmp.lt.u32.totalorder %s4608_s4, %s6010_s6 }
 0x25f   : > { %p4610_p1 = pnand %p4609_p9, %p4798_p10 }
 0x260   : > { %p4615_p11 = por %p4614_p7, %p4613_p3 }
 0x261   : > { %p4611_p2 = pneg %p4610_p1 }
 0x262   : > { %p4617_p6 = por %p4616_p4, %p4615_p11 }
 0x264   : > { %p4618_p8 = pnand %p4617_p6, %p4611_p2 }
 0x266   : > { %4621 = shalt.err (!%p4618_p8)
}
 0x267   : > { %s4689_s17 = smov 128   ;;  %s4690_s19 = smov 8  }
 0x268   : > { %4463 = dma.vmem_to_hbm [thread:$0]  (%p4798_p10), %s6012_s30, 4096, %s6010_s6, %s3027_s12, %s4689_s17, %s4689_s17, %s4690_s19  }
 0x269 PF: > { %s3058_s21 = sand.u32 1, %s4660_s9   ;;  %p6258_p12 = scmp.ne.s32.totalorder %s6148_s20, 0 }
 0x26a   : > { %p6259_p13 = scmp.ge.s32.totalorder %s4680_s14, 2  ;;  %s3059_s3 = scalar_lea.sflag [#allocation4], %s3058_s21 }
 0x26c   : > { %p4474_p0 = pnand %p6259_p13, %p6258_p12 }
 0x26e   : > { %4655 = dma.done.wait (!%p4474_p0), %s3059_s3, 4096  }
 0x26f   : > { %4657 = vsyncadd (!%p4474_p0), %s3059_s3, 4294963200  ;;  %s19_s14 = sadd.s32 1, %s4680_s14   ;;  %s6260_s9 = smov %s4664_s10 }
 0x270   : > { %p16_p5 = scmp.ge.s32.totalorder %s19_s14, 4   ;;  %s6261_s10 = smov %s4668_s11 }
 0x271   : > { %s6262_s11 = smov %s4807_s28  ;;  %s6263_s12 = smov %s4676_s13 }
 0x272   : > { %s6264_s13 = smov %s6266_s25  ;;  %18 = sbr.rel (!%p16_p5) target bundleno = 7 (0x7), region = 85 }
 0x279   :  { %3064 = vsyncpa [#allocation3], 1 }
 0x27a   :  { %3066 = vsyncpa [#allocation3 + $0x1], 1 }
 0x27b   :  { %3067 = vsyncpa [#allocation6], 1 }
 0x27c   :  { %3068 = vsyncpa [#allocation4], 1 }
 0x27d   :  { %3070 = vsyncpa [#allocation4 + $0x1], 1 }

</bundles_post_ra>
